<compile_context>
chip_gen: v7x
topology: tpu7x:2x2x1
jax: 0.10.0
libtpu: 0.0.40
codegen_flags: <defaults>
</compile_context>

<pallas_src>
import math
import functools

import jax
import jax.numpy as jnp
from jax.experimental import pallas as pl
from jax.experimental.pallas import tpu as pltpu

F32 = jnp.float32
MXU_DTYPE = jnp.bfloat16   # matmul-input dtype; accumulation is f32
LN_EPS = 1e-5


# ----------------------------- in-kernel helpers -----------------------------

def _mm(a, b):
    """a @ b, bf16 MXU inputs, f32 accumulation. Weights already [in, out]."""
    return jax.lax.dot_general(
        a.astype(MXU_DTYPE), b.astype(MXU_DTYPE),
        dimension_numbers=(((1,), (0,)), ((), ())),
        preferred_element_type=jnp.float32)


def _mm_nt(a, b):
    """a @ b.T via dot_general NT form (no materialized transpose)."""
    return jax.lax.dot_general(
        a.astype(MXU_DTYPE), b.astype(MXU_DTYPE),
        dimension_numbers=(((1,), (1,)), ((), ())),
        preferred_element_type=jnp.float32)


def _ln(x, g, b, eps):
    """Row-wise LayerNorm (biased variance, matches torch), f32 statistics."""
    x = x.astype(jnp.float32)
    mu = jnp.mean(x, axis=-1, keepdims=True)
    var = jnp.mean((x - mu) ** 2, axis=-1, keepdims=True)
    return (x - mu) * jax.lax.rsqrt(var + eps) * g + b


def _rep_spec(shape):
    """BlockSpec for operands (weights) identical at every grid step."""
    nd = len(shape)
    return pl.BlockSpec(shape, lambda *_, nd=nd: (0,) * nd)


# ----------------------------- Pallas kernels -----------------------------

def _embed_ln_kernel(x_ref, pos_ref, w_ref, b_ref, g_ref, beta_ref, o_ref, *,
                     d_model, eps):
    # x_ref: [1, S, Fin] (one batch); pos: [S, D]
    x = x_ref[0]
    h = _mm(x, w_ref[...]) + b_ref[...]                       # [S, D]
    h = h * jnp.float32(math.sqrt(d_model)) + pos_ref[...]    # scale + pos enc
    o_ref[0] = _ln(h, g_ref[...], beta_ref[...], eps).astype(o_ref.dtype)


def _encoder_layer_kernel(h_ref, bias_ref,
                          w_qkv_ref, b_qkv_ref, w_out_ref, b_out_ref,
                          ln1_g_ref, ln1_b_ref,
                          w_ff1_ref, b_ff1_ref, w_ff2_ref, b_ff2_ref,
                          ln2_g_ref, ln2_b_ref,
                          o_ref, *, nhead, d_model, eps):
    S = h_ref.shape[1]
    Dh = d_model // nhead
    scale = 1.0 / math.sqrt(Dh)

    h = h_ref[0].astype(jnp.float32)       # [S, D]
    key_bias = bias_ref[0]                 # [1, S] additive: 0 keep, -1e30 pad (f32)

    # Fused QKV projection.
    qkv = _mm(h, w_qkv_ref[...]) + b_qkv_ref[...]             # [S, 3D] f32

    # Per-head attention with the out-projection folded into the head loop
    # (avoids a concat; head split is in-kernel vreg slicing, not HBM transposes).
    w_out = w_out_ref[...]                                    # [D, D]
    attn = jnp.zeros((S, d_model), jnp.float32)
    for hh in range(nhead):
        lo, hi = hh * Dh, (hh + 1) * Dh
        qh = qkv[:, lo:hi]                                    # [S, Dh]
        kh = qkv[:, d_model + lo:d_model + hi]
        vh = qkv[:, 2 * d_model + lo:2 * d_model + hi]
        s = _mm_nt(qh, kh) * scale + key_bias                 # [S, S]
        s = s - jnp.max(s, axis=-1, keepdims=True)
        p = jnp.exp(s)
        p = p / jnp.sum(p, axis=-1, keepdims=True)
        ctx = _mm(p, vh)                                      # [S, Dh]
        attn = attn + _mm(ctx, w_out[lo:hi, :])               # accumulate out-proj
    attn = attn + b_out_ref[...]

    # Post-norm (norm_first=False): residual + LN1.
    h1 = _ln(h + attn, ln1_g_ref[...], ln1_b_ref[...], eps)

    # Feed-forward (ReLU) + residual + LN2.
    ff = jnp.maximum(_mm(h1, w_ff1_ref[...]) + b_ff1_ref[...], 0.0)
    ff = _mm(ff, w_ff2_ref[...]) + b_ff2_ref[...]
    h2 = _ln(h1 + ff, ln2_g_ref[...], ln2_b_ref[...], eps)

    o_ref[0] = h2.astype(o_ref.dtype)


def _head_kernel(h_ref, m_ref, win_ref,
                 w_win_ref, b_win_ref, g_win_ref, beta_win_ref,
                 w_c1_ref, b_c1_ref, w_c2_ref, b_c2_ref,
                 o_ref, *, d_model, eps):
    # TODO(synk): pooling could be folded into the last encoder layer's LN2
    # epilogue to save one read of [B,S,D]; kept separate for simplicity.
    h = h_ref[...].astype(jnp.float32)                        # [B, S, D]
    m = m_ref[...].astype(jnp.float32)                        # [B, S]

    hm = h * m[:, :, None]                                    # x * mask.unsqueeze(-1)
    cnt = jnp.maximum(jnp.sum(m, axis=1, keepdims=True), 1e-9)
    pooled = jnp.sum(hm, axis=1) / cnt                        # [B, D]

    # win_features_processor: Linear -> ReLU -> LayerNorm
    win = _mm(win_ref[...], w_win_ref[...]) + b_win_ref[...]
    win = jnp.maximum(win, 0.0)
    win = _ln(win, g_win_ref[...], beta_win_ref[...], eps)    # [B, 64]

    # classifier: concat([pooled, win]) @ W1 == pooled @ W1[:D] + win @ W1[D:]
    z = (_mm(pooled, w_c1_ref[:d_model, :])
         + _mm(win, w_c1_ref[d_model:, :])
         + b_c1_ref[...])
    z = jnp.maximum(z, 0.0)                                   # (Dropout = identity)
    out = _mm(z, w_c2_ref[...]) + b_c2_ref[...]               # [B, 1]
    o_ref[...] = out.astype(o_ref.dtype)


# ----------------------------- kernel wrappers -----------------------------

def embed_and_norm(x, p):
    B, S, Fin = x.shape
    D = p['pos'].shape[1]
    pos = p['pos'][:S]
    kern = functools.partial(_embed_ln_kernel, d_model=D, eps=LN_EPS)
    return pl.pallas_call(
        kern,
        grid=(B,),
        in_specs=[
            pl.BlockSpec((1, S, Fin), lambda b: (b, 0, 0)),
            _rep_spec((S, D)),
            _rep_spec((Fin, D)),
            _rep_spec((1, D)),
            _rep_spec((1, D)),
            _rep_spec((1, D)),
        ],
        out_specs=pl.BlockSpec((1, S, D), lambda b: (b, 0, 0)),
        out_shape=jax.ShapeDtypeStruct((B, S, D), F32),
        compiler_params=pltpu.CompilerParams(dimension_semantics=("parallel",)),
    )(x, pos, p['emb_w'], p['emb_b'], p['ln0_g'], p['ln0_b'])


def encoder_layer(h, key_bias, L, nhead):
    B, S, D = h.shape
    kern = functools.partial(_encoder_layer_kernel, nhead=nhead, d_model=D,
                             eps=LN_EPS)
    weights = (L['w_qkv'], L['b_qkv'], L['w_out'], L['b_out'],
               L['ln1_g'], L['ln1_b'],
               L['w_ff1'], L['b_ff1'], L['w_ff2'], L['b_ff2'],
               L['ln2_g'], L['ln2_b'])
    in_specs = ([pl.BlockSpec((1, S, D), lambda b: (b, 0, 0)),
                 pl.BlockSpec((1, 1, S), lambda b: (b, 0, 0))]
                + [_rep_spec(w.shape) for w in weights])
    return pl.pallas_call(
        kern,
        grid=(B,),
        in_specs=in_specs,
        out_specs=pl.BlockSpec((1, S, D), lambda b: (b, 0, 0)),
        out_shape=jax.ShapeDtypeStruct((B, S, D), F32),
        compiler_params=pltpu.CompilerParams(dimension_semantics=("parallel",)),
    )(h, key_bias, *weights)


def pool_win_classify(h, mask_f, win_feats, p):
    B, S, D = h.shape
    kern = functools.partial(_head_kernel, d_model=D, eps=LN_EPS)
    args = (h, mask_f, win_feats,
            p['win_w'], p['win_b'], p['win_ln_g'], p['win_ln_b'],
            p['cls1_w'], p['cls1_b'], p['cls2_w'], p['cls2_b'])
    return pl.pallas_call(
        kern,
        grid=(1,),
        in_specs=[_rep_spec(a.shape) for a in args],
        out_specs=pl.BlockSpec((B, 1), lambda i: (0, 0)),
        out_shape=jax.ShapeDtypeStruct((B, 1), F32),
    )(*args)


# ----------------------------- parameters -----------------------------

def init_params(key, input_dim, d_model, nhead, num_layers, max_seq_len, win_dim):
    assert d_model % nhead == 0
    keys = iter(jax.random.split(key, 16 + 8 * num_layers))

    def w(shape, scale=0.02):
        return (scale * jax.random.normal(next(keys), shape)).astype(F32)

    # NOTE: all weight matrices stored pre-transposed ([in, out]) so the
    # kernels compute x @ W with no in-kernel transpose; biases are [1, out].
    p = {
        'emb_w': w((input_dim, d_model)),
        'emb_b': w((1, d_model)),
        'pos': w((max_seq_len, d_model)),          # nn.Embedding(max_seq_len, d_model)
        'ln0_g': jnp.ones((1, d_model), F32),
        'ln0_b': jnp.zeros((1, d_model), F32),
        'win_w': w((win_dim, 64)),
        'win_b': w((1, 64)),
        'win_ln_g': jnp.ones((1, 64), F32),
        'win_ln_b': jnp.zeros((1, 64), F32),
        'cls1_w': w((d_model + 64, 64)),
        'cls1_b': w((1, 64)),
        'cls2_w': w((64, 1)),
        'cls2_b': w((1, 1)),
    }
    layers = []
    for _ in range(num_layers):
        layers.append({
            'w_qkv': w((d_model, 3 * d_model)),    # MHA in_proj (transposed)
            'b_qkv': w((1, 3 * d_model)),
            'w_out': w((d_model, d_model)),        # MHA out_proj (transposed)
            'b_out': w((1, d_model)),
            'ln1_g': jnp.ones((1, d_model), F32),
            'ln1_b': jnp.zeros((1, d_model), F32),
            'w_ff1': w((d_model, 4 * d_model)),
            'b_ff1': w((1, 4 * d_model)),
            'w_ff2': w((4 * d_model, d_model)),
            'b_ff2': w((1, d_model)),
            'ln2_g': jnp.ones((1, d_model), F32),
            'ln2_b': jnp.zeros((1, d_model), F32),
        })
    p['layers'] = layers
    return p


# ----------------------------- forward pass -----------------------------

def forward(params, x, mask, win_level_features, nhead):
    B, S, _ = x.shape
    mask_f = mask.astype(F32)
    # src_key_padding_mask = ~mask -> additive key bias (kept in f32).
    key_bias = jnp.where(mask_f > 0, 0.0, -1e30).astype(F32).reshape(B, 1, S)

    # embedding * sqrt(D) + positional encoding + LayerNorm (one fused kernel)
    h = embed_and_norm(x, params)                              # [B, S, D]

    # nn.TransformerEncoder: one fused kernel per layer (post-norm, relu FFN,
    # dropout = eval identity)
    for L in params['layers']:
        h = encoder_layer(h, key_bias, L, nhead)

    # masked mean pooling + win-feature processor + classifier (one fused kernel)
    out = pool_win_classify(h, mask_f, win_level_features, params)   # [B, 1]
    return out[:, 0]


# ----------------------------- driver -----------------------------

if __name__ == "__main__":
    INPUT_DIM = 16        # FEATURE_DIM (synthetic)
    D_MODEL = 32
    NHEAD = 4
    NUM_LAYERS = 2
    MAX_SEQ_LEN = 8       # MAX_SEQ_LEN (synthetic)
    WIN_DIM = 99          # win_level_features_dim
    B, S = 2, 8

    key = jax.random.PRNGKey(0)
    kp, kx, kw = jax.random.split(key, 3)
    params = init_params(kp, INPUT_DIM, D_MODEL, NHEAD, NUM_LAYERS,
                         MAX_SEQ_LEN, WIN_DIM)

    x = jax.random.normal(kx, (B, S, INPUT_DIM), dtype=F32)
    win_feats = jax.random.normal(kw, (B, WIN_DIM), dtype=F32)
    lengths = jnp.array([S, S - 3], dtype=jnp.int32)
    mask = jnp.arange(S)[None, :] < lengths[:, None]   # bool, True = valid token

    fwd = jax.jit(functools.partial(forward, nhead=NHEAD))
    out = fwd(params, x, mask, win_feats)
    out = jax.block_until_ready(out)
    assert out.shape == (B,)
    assert bool(jnp.all(jnp.isfinite(out)))
    print("KERNEL_OK")
</pallas_src>

<mosaic_0001>
module attributes {stable_mosaic.version = 11 : i64} {
  func.func @_embed_ln_kernel(%arg0: i32, %arg1: memref<1x8x16xf32, #tpu.memory_space<vmem>>, %arg2: memref<8x32xf32, #tpu.memory_space<vmem>>, %arg3: memref<16x32xf32, #tpu.memory_space<vmem>>, %arg4: memref<1x32xf32, #tpu.memory_space<vmem>>, %arg5: memref<1x32xf32, #tpu.memory_space<vmem>>, %arg6: memref<1x32xf32, #tpu.memory_space<vmem>>, %arg7: memref<1x8x32xf32, #tpu.memory_space<vmem>>) attributes {dimension_semantics = [#tpu.dimension_semantics<parallel>], iteration_bounds = array<i64: 2>, scalar_prefetch = 0 : i64, scratch_operands = 0 : i64, tpu.core_type = #tpu.core_type<tc>, window_params = [{transform_indices = @transform_0, window_bounds = array<i64: 1, 8, 16>}, {pipeline_mode = #tpu.pipeline_mode<synchronous>, transform_indices = @transform_1, window_bounds = array<i64: 8, 32>}, {pipeline_mode = #tpu.pipeline_mode<synchronous>, transform_indices = @transform_2, window_bounds = array<i64: 16, 32>}, {pipeline_mode = #tpu.pipeline_mode<synchronous>, transform_indices = @transform_3, window_bounds = array<i64: 1, 32>}, {pipeline_mode = #tpu.pipeline_mode<synchronous>, transform_indices = @transform_4, window_bounds = array<i64: 1, 32>}, {pipeline_mode = #tpu.pipeline_mode<synchronous>, transform_indices = @transform_5, window_bounds = array<i64: 1, 32>}, {transform_indices = @transform_6, window_bounds = array<i64: 1, 8, 32>}]} {
    %c0 = arith.constant 0 : index
    %c0_0 = arith.constant 0 : index
    %c0_1 = arith.constant 0 : index
    %0 = vector.load %arg1[%c0, %c0_0, %c0_1] : memref<1x8x16xf32, #tpu.memory_space<vmem>>, vector<1x8x16xf32>
    %1 = vector.shape_cast %0 : vector<1x8x16xf32> to vector<8x16xf32>
    %c0_2 = arith.constant 0 : index
    %c0_3 = arith.constant 0 : index
    %2 = vector.load %arg3[%c0_2, %c0_3] : memref<16x32xf32, #tpu.memory_space<vmem>>, vector<16x32xf32>
    %3 = arith.truncf %1 : vector<8x16xf32> to vector<8x16xbf16>
    %4 = arith.truncf %2 : vector<16x32xf32> to vector<16x32xbf16>
    %cst = arith.constant dense<0.000000e+00> : vector<8x32xf32>
    %5 = tpu.matmul %3, %4, %cst {dimension_numbers = #tpu.dot_dimension_numbers<[1], [0], [0], [1], [0, 0, 1, 1], [], []>} : vector<8x16xbf16>, vector<16x32xbf16>, vector<8x32xf32> -> vector<8x32xf32>
    %c0_4 = arith.constant 0 : index
    %c0_5 = arith.constant 0 : index
    %6 = vector.load %arg4[%c0_4, %c0_5] : memref<1x32xf32, #tpu.memory_space<vmem>>, vector<1x32xf32>
    %7 = vector.broadcast %6 : vector<1x32xf32> to vector<8x32xf32>
    %8 = arith.addf %5, %7 : vector<8x32xf32>
    %cst_6 = arith.constant 5.65685415 : f32
    %9 = vector.broadcast %cst_6 : f32 to vector<8x32xf32>
    %10 = arith.mulf %8, %9 : vector<8x32xf32>
    %c0_7 = arith.constant 0 : index
    %c0_8 = arith.constant 0 : index
    %11 = vector.load %arg2[%c0_7, %c0_8] : memref<8x32xf32, #tpu.memory_space<vmem>>, vector<8x32xf32>
    %12 = arith.addf %10, %11 : vector<8x32xf32>
    %c0_9 = arith.constant 0 : index
    %c0_10 = arith.constant 0 : index
    %13 = vector.load %arg5[%c0_9, %c0_10] : memref<1x32xf32, #tpu.memory_space<vmem>>, vector<1x32xf32>
    %c0_11 = arith.constant 0 : index
    %c0_12 = arith.constant 0 : index
    %14 = vector.load %arg6[%c0_11, %c0_12] : memref<1x32xf32, #tpu.memory_space<vmem>>, vector<1x32xf32>
    %cst_13 = arith.constant dense<0.000000e+00> : vector<8xf32>
    %15 = vector.multi_reduction <add>, %12, %cst_13 [1] : vector<8x32xf32> to vector<8xf32>
    %16 = vector.shape_cast %15 : vector<8xf32> to vector<8x1xf32>
    %cst_14 = arith.constant 3.200000e+01 : f32
    %17 = vector.broadcast %cst_14 : f32 to vector<8x1xf32>
    %18 = arith.divf %16, %17 : vector<8x1xf32>
    %19 = vector.broadcast %18 : vector<8x1xf32> to vector<8x32xf32>
    %20 = arith.subf %12, %19 : vector<8x32xf32>
    %21 = arith.mulf %20, %20 : vector<8x32xf32>
    %cst_15 = arith.constant dense<0.000000e+00> : vector<8xf32>
    %22 = vector.multi_reduction <add>, %21, %cst_15 [1] : vector<8x32xf32> to vector<8xf32>
    %23 = vector.shape_cast %22 : vector<8xf32> to vector<8x1xf32>
    %cst_16 = arith.constant 3.200000e+01 : f32
    %24 = vector.broadcast %cst_16 : f32 to vector<8x1xf32>
    %25 = arith.divf %23, %24 : vector<8x1xf32>
    %26 = vector.broadcast %18 : vector<8x1xf32> to vector<8x32xf32>
    %27 = arith.subf %12, %26 : vector<8x32xf32>
    %cst_17 = arith.constant 9.99999974E-6 : f32
    %28 = vector.broadcast %cst_17 : f32 to vector<8x1xf32>
    %29 = arith.addf %25, %28 : vector<8x1xf32>
    %30 = math.rsqrt %29 : vector<8x1xf32>
    %31 = vector.broadcast %30 : vector<8x1xf32> to vector<8x32xf32>
    %32 = arith.mulf %27, %31 : vector<8x32xf32>
    %33 = vector.broadcast %13 : vector<1x32xf32> to vector<8x32xf32>
    %34 = arith.mulf %32, %33 : vector<8x32xf32>
    %35 = vector.broadcast %14 : vector<1x32xf32> to vector<8x32xf32>
    %36 = arith.addf %34, %35 : vector<8x32xf32>
    %c0_18 = arith.constant 0 : index
    %c0_19 = arith.constant 0 : index
    %c0_20 = arith.constant 0 : index
    %37 = vector.load %arg7[%c0_18, %c0_19, %c0_20] : memref<1x8x32xf32, #tpu.memory_space<vmem>>, vector<1x8x32xf32>
    %38 = vector.shape_cast %37 : vector<1x8x32xf32> to vector<8x32xf32>
    %39 = vector.shape_cast %36 : vector<8x32xf32> to vector<1x8x32xf32>
    tpu.vector_store %arg7[%c0_18, %c0_19, %c0_20], %39 {strides = array<i32>} : memref<1x8x32xf32, #tpu.memory_space<vmem>>, vector<1x8x32xf32>,
    return
  }
  func.func @transform_0(%arg0: i32) -> (i32, i32, i32) {
    %c0_i32 = arith.constant 0 : i32
    %c0_i32_0 = arith.constant 0 : i32
    %c0_i32_1 = arith.constant 0 : i32
    return %arg0, %c0_i32, %c0_i32_0 : i32, i32, i32
  }
  func.func @transform_1(%arg0: i32) -> (i32, i32) {
    %c0_i32 = arith.constant 0 : i32
    %c0_i32_0 = arith.constant 0 : i32
    %c0_i32_1 = arith.constant 0 : i32
    return %c0_i32, %c0_i32_0 : i32, i32
  }
  func.func @transform_2(%arg0: i32) -> (i32, i32) {
    %c0_i32 = arith.constant 0 : i32
    %c0_i32_0 = arith.constant 0 : i32
    %c0_i32_1 = arith.constant 0 : i32
    return %c0_i32, %c0_i32_0 : i32, i32
  }
  func.func @transform_3(%arg0: i32) -> (i32, i32) {
    %c0_i32 = arith.constant 0 : i32
    %c0_i32_0 = arith.constant 0 : i32
    %c0_i32_1 = arith.constant 0 : i32
    return %c0_i32, %c0_i32_0 : i32, i32
  }
  func.func @transform_4(%arg0: i32) -> (i32, i32) {
    %c0_i32 = arith.constant 0 : i32
    %c0_i32_0 = arith.constant 0 : i32
    %c0_i32_1 = arith.constant 0 : i32
    return %c0_i32, %c0_i32_0 : i32, i32
  }
  func.func @transform_5(%arg0: i32) -> (i32, i32) {
    %c0_i32 = arith.constant 0 : i32
    %c0_i32_0 = arith.constant 0 : i32
    %c0_i32_1 = arith.constant 0 : i32
    return %c0_i32, %c0_i32_0 : i32, i32
  }
  func.func @transform_6(%arg0: i32) -> (i32, i32, i32) {
    %c0_i32 = arith.constant 0 : i32
    %c0_i32_0 = arith.constant 0 : i32
    %c0_i32_1 = arith.constant 0 : i32
    return %arg0, %c0_i32, %c0_i32_0 : i32, i32, i32
  }
}

module attributes {stable_mosaic.version = 11 : i64} {
  func.func @_encoder_layer_kernel(%arg0: i32, %arg1: memref<1x8x32xf32, #tpu.memory_space<vmem>>, %arg2: memref<1x1x8xf32, #tpu.memory_space<vmem>>, %arg3: memref<32x96xf32, #tpu.memory_space<vmem>>, %arg4: memref<1x96xf32, #tpu.memory_space<vmem>>, %arg5: memref<32x32xf32, #tpu.memory_space<vmem>>, %arg6: memref<1x32xf32, #tpu.memory_space<vmem>>, %arg7: memref<1x32xf32, #tpu.memory_space<vmem>>, %arg8: memref<1x32xf32, #tpu.memory_space<vmem>>, %arg9: memref<32x128xf32, #tpu.memory_space<vmem>>, %arg10: memref<1x128xf32, #tpu.memory_space<vmem>>, %arg11: memref<128x32xf32, #tpu.memory_space<vmem>>, %arg12: memref<1x32xf32, #tpu.memory_space<vmem>>, %arg13: memref<1x32xf32, #tpu.memory_space<vmem>>, %arg14: memref<1x32xf32, #tpu.memory_space<vmem>>, %arg15: memref<1x8x32xf32, #tpu.memory_space<vmem>>) attributes {dimension_semantics = [#tpu.dimension_semantics<parallel>], iteration_bounds = array<i64: 2>, scalar_prefetch = 0 : i64, scratch_operands = 0 : i64, tpu.core_type = #tpu.core_type<tc>, window_params = [{transform_indices = @transform_0, window_bounds = array<i64: 1, 8, 32>}, {transform_indices = @transform_1, window_bounds = array<i64: 1, 1, 8>}, {pipeline_mode = #tpu.pipeline_mode<synchronous>, transform_indices = @transform_2, window_bounds = array<i64: 32, 96>}, {pipeline_mode = #tpu.pipeline_mode<synchronous>, transform_indices = @transform_3, window_bounds = array<i64: 1, 96>}, {pipeline_mode = #tpu.pipeline_mode<synchronous>, transform_indices = @transform_4, window_bounds = array<i64: 32, 32>}, {pipeline_mode = #tpu.pipeline_mode<synchronous>, transform_indices = @transform_5, window_bounds = array<i64: 1, 32>}, {pipeline_mode = #tpu.pipeline_mode<synchronous>, transform_indices = @transform_6, window_bounds = array<i64: 1, 32>}, {pipeline_mode = #tpu.pipeline_mode<synchronous>, transform_indices = @transform_7, window_bounds = array<i64: 1, 32>}, {pipeline_mode = #tpu.pipeline_mode<synchronous>, transform_indices = @transform_8, window_bounds = array<i64: 32, 128>}, {pipeline_mode = #tpu.pipeline_mode<synchronous>, transform_indices = @transform_9, window_bounds = array<i64: 1, 128>}, {pipeline_mode = #tpu.pipeline_mode<synchronous>, transform_indices = @transform_10, window_bounds = array<i64: 128, 32>}, {pipeline_mode = #tpu.pipeline_mode<synchronous>, transform_indices = @transform_11, window_bounds = array<i64: 1, 32>}, {pipeline_mode = #tpu.pipeline_mode<synchronous>, transform_indices = @transform_12, window_bounds = array<i64: 1, 32>}, {pipeline_mode = #tpu.pipeline_mode<synchronous>, transform_indices = @transform_13, window_bounds = array<i64: 1, 32>}, {transform_indices = @transform_14, window_bounds = array<i64: 1, 8, 32>}]} {
    %c0 = arith.constant 0 : index
    %c0_0 = arith.constant 0 : index
    %c0_1 = arith.constant 0 : index
    %0 = vector.load %arg1[%c0, %c0_0, %c0_1] : memref<1x8x32xf32, #tpu.memory_space<vmem>>, vector<1x8x32xf32>
    %1 = vector.shape_cast %0 : vector<1x8x32xf32> to vector<8x32xf32>
    %c0_2 = arith.constant 0 : index
    %c0_3 = arith.constant 0 : index
    %c0_4 = arith.constant 0 : index
    %2 = vector.load %arg2[%c0_2, %c0_3, %c0_4] : memref<1x1x8xf32, #tpu.memory_space<vmem>>, vector<1x1x8xf32>
    %3 = vector.shape_cast %2 : vector<1x1x8xf32> to vector<1x8xf32>
    %c0_5 = arith.constant 0 : index
    %c0_6 = arith.constant 0 : index
    %4 = vector.load %arg3[%c0_5, %c0_6] : memref<32x96xf32, #tpu.memory_space<vmem>>, vector<32x96xf32>
    %5 = arith.truncf %1 : vector<8x32xf32> to vector<8x32xbf16>
    %6 = arith.truncf %4 : vector<32x96xf32> to vector<32x96xbf16>
    %cst = arith.constant dense<0.000000e+00> : vector<8x96xf32>
    %7 = tpu.matmul %5, %6, %cst {dimension_numbers = #tpu.dot_dimension_numbers<[1], [0], [0], [1], [0, 0, 1, 1], [], []>} : vector<8x32xbf16>, vector<32x96xbf16>, vector<8x96xf32> -> vector<8x96xf32>
    %c0_7 = arith.constant 0 : index
    %c0_8 = arith.constant 0 : index
    %8 = vector.load %arg4[%c0_7, %c0_8] : memref<1x96xf32, #tpu.memory_space<vmem>>, vector<1x96xf32>
    %9 = vector.broadcast %8 : vector<1x96xf32> to vector<8x96xf32>
    %10 = arith.addf %7, %9 : vector<8x96xf32>
    %c0_9 = arith.constant 0 : index
    %c0_10 = arith.constant 0 : index
    %11 = vector.load %arg5[%c0_9, %c0_10] : memref<32x32xf32, #tpu.memory_space<vmem>>, vector<32x32xf32>
    %cst_11 = arith.constant 0.000000e+00 : f32
    %12 = vector.broadcast %cst_11 : f32 to vector<8x32xf32>
    %13 = vector.extract_strided_slice %10 {offsets = [0, 0], sizes = [8, 8], strides = [1, 1]} : vector<8x96xf32> to vector<8x8xf32>
    %14 = vector.extract_strided_slice %10 {offsets = [0, 32], sizes = [8, 8], strides = [1, 1]} : vector<8x96xf32> to vector<8x8xf32>
    %15 = vector.extract_strided_slice %10 {offsets = [0, 64], sizes = [8, 8], strides = [1, 1]} : vector<8x96xf32> to vector<8x8xf32>
    %16 = arith.truncf %13 : vector<8x8xf32> to vector<8x8xbf16>
    %17 = arith.truncf %14 : vector<8x8xf32> to vector<8x8xbf16>
    %cst_12 = arith.constant dense<0.000000e+00> : vector<8x8xf32>
    %18 = tpu.matmul %16, %17, %cst_12 {dimension_numbers = #tpu.dot_dimension_numbers<[1], [1], [0], [0], [0, 0, 1, 0], [], []>} : vector<8x8xbf16>, vector<8x8xbf16>, vector<8x8xf32> -> vector<8x8xf32>
    %cst_13 = arith.constant 0.353553385 : f32
    %19 = vector.broadcast %cst_13 : f32 to vector<8x8xf32>
    %20 = arith.mulf %18, %19 : vector<8x8xf32>
    %21 = vector.broadcast %3 : vector<1x8xf32> to vector<8x8xf32>
    %22 = arith.addf %20, %21 : vector<8x8xf32>
    %cst_14 = arith.constant dense<0xFF800000> : vector<8xf32>
    %23 = vector.multi_reduction <maximumf>, %22, %cst_14 [1] : vector<8x8xf32> to vector<8xf32>
    %24 = vector.shape_cast %23 : vector<8xf32> to vector<8x1xf32>
    %25 = vector.broadcast %24 : vector<8x1xf32> to vector<8x8xf32>
    %26 = arith.subf %22, %25 : vector<8x8xf32>
    %27 = math.exp %26 : vector<8x8xf32>
    %cst_15 = arith.constant dense<0.000000e+00> : vector<8xf32>
    %28 = vector.multi_reduction <add>, %27, %cst_15 [1] : vector<8x8xf32> to vector<8xf32>
    %29 = vector.shape_cast %28 : vector<8xf32> to vector<8x1xf32>
    %30 = vector.broadcast %29 : vector<8x1xf32> to vector<8x8xf32>
    %31 = arith.divf %27, %30 : vector<8x8xf32>
    %32 = arith.truncf %31 : vector<8x8xf32> to vector<8x8xbf16>
    %33 = arith.truncf %15 : vector<8x8xf32> to vector<8x8xbf16>
    %cst_16 = arith.constant dense<0.000000e+00> : vector<8x8xf32>
    %34 = tpu.matmul %32, %33, %cst_16 {dimension_numbers = #tpu.dot_dimension_numbers<[1], [0], [0], [1], [0, 0, 1, 1], [], []>} : vector<8x8xbf16>, vector<8x8xbf16>, vector<8x8xf32> -> vector<8x8xf32>
    %35 = vector.extract_strided_slice %11 {offsets = [0, 0], sizes = [8, 32], strides = [1, 1]} : vector<32x32xf32> to vector<8x32xf32>
    %36 = arith.truncf %34 : vector<8x8xf32> to vector<8x8xbf16>
    %37 = arith.truncf %35 : vector<8x32xf32> to vector<8x32xbf16>
    %cst_17 = arith.constant dense<0.000000e+00> : vector<8x32xf32>
    %38 = tpu.matmul %36, %37, %cst_17 {dimension_numbers = #tpu.dot_dimension_numbers<[1], [0], [0], [1], [0, 0, 1, 1], [], []>} : vector<8x8xbf16>, vector<8x32xbf16>, vector<8x32xf32> -> vector<8x32xf32>
    %39 = arith.addf %12, %38 : vector<8x32xf32>
    %40 = vector.extract_strided_slice %10 {offsets = [0, 8], sizes = [8, 8], strides = [1, 1]} : vector<8x96xf32> to vector<8x8xf32>
    %41 = vector.extract_strided_slice %10 {offsets = [0, 40], sizes = [8, 8], strides = [1, 1]} : vector<8x96xf32> to vector<8x8xf32>
    %42 = vector.extract_strided_slice %10 {offsets = [0, 72], sizes = [8, 8], strides = [1, 1]} : vector<8x96xf32> to vector<8x8xf32>
    %43 = arith.truncf %40 : vector<8x8xf32> to vector<8x8xbf16>
    %44 = arith.truncf %41 : vector<8x8xf32> to vector<8x8xbf16>
    %cst_18 = arith.constant dense<0.000000e+00> : vector<8x8xf32>
    %45 = tpu.matmul %43, %44, %cst_18 {dimension_numbers = #tpu.dot_dimension_numbers<[1], [1], [0], [0], [0, 0, 1, 0], [], []>} : vector<8x8xbf16>, vector<8x8xbf16>, vector<8x8xf32> -> vector<8x8xf32>
    %cst_19 = arith.constant 0.353553385 : f32
    %46 = vector.broadcast %cst_19 : f32 to vector<8x8xf32>
    %47 = arith.mulf %45, %46 : vector<8x8xf32>
    %48 = vector.broadcast %3 : vector<1x8xf32> to vector<8x8xf32>
    %49 = arith.addf %47, %48 : vector<8x8xf32>
    %cst_20 = arith.constant dense<0xFF800000> : vector<8xf32>
    %50 = vector.multi_reduction <maximumf>, %49, %cst_20 [1] : vector<8x8xf32> to vector<8xf32>
    %51 = vector.shape_cast %50 : vector<8xf32> to vector<8x1xf32>
    %52 = vector.broadcast %51 : vector<8x1xf32> to vector<8x8xf32>
    %53 = arith.subf %49, %52 : vector<8x8xf32>
    %54 = math.exp %53 : vector<8x8xf32>
    %cst_21 = arith.constant dense<0.000000e+00> : vector<8xf32>
    %55 = vector.multi_reduction <add>, %54, %cst_21 [1] : vector<8x8xf32> to vector<8xf32>
    %56 = vector.shape_cast %55 : vector<8xf32> to vector<8x1xf32>
    %57 = vector.broadcast %56 : vector<8x1xf32> to vector<8x8xf32>
    %58 = arith.divf %54, %57 : vector<8x8xf32>
    %59 = arith.truncf %58 : vector<8x8xf32> to vector<8x8xbf16>
    %60 = arith.truncf %42 : vector<8x8xf32> to vector<8x8xbf16>
    %cst_22 = arith.constant dense<0.000000e+00> : vector<8x8xf32>
    %61 = tpu.matmul %59, %60, %cst_22 {dimension_numbers = #tpu.dot_dimension_numbers<[1], [0], [0], [1], [0, 0, 1, 1], [], []>} : vector<8x8xbf16>, vector<8x8xbf16>, vector<8x8xf32> -> vector<8x8xf32>
    %62 = vector.extract_strided_slice %11 {offsets = [8, 0], sizes = [8, 32], strides = [1, 1]} : vector<32x32xf32> to vector<8x32xf32>
    %63 = arith.truncf %61 : vector<8x8xf32> to vector<8x8xbf16>
    %64 = arith.truncf %62 : vector<8x32xf32> to vector<8x32xbf16>
    %cst_23 = arith.constant dense<0.000000e+00> : vector<8x32xf32>
    %65 = tpu.matmul %63, %64, %cst_23 {dimension_numbers = #tpu.dot_dimension_numbers<[1], [0], [0], [1], [0, 0, 1, 1], [], []>} : vector<8x8xbf16>, vector<8x32xbf16>, vector<8x32xf32> -> vector<8x32xf32>
    %66 = arith.addf %39, %65 : vector<8x32xf32>
    %67 = vector.extract_strided_slice %10 {offsets = [0, 16], sizes = [8, 8], strides = [1, 1]} : vector<8x96xf32> to vector<8x8xf32>
    %68 = vector.extract_strided_slice %10 {offsets = [0, 48], sizes = [8, 8], strides = [1, 1]} : vector<8x96xf32> to vector<8x8xf32>
    %69 = vector.extract_strided_slice %10 {offsets = [0, 80], sizes = [8, 8], strides = [1, 1]} : vector<8x96xf32> to vector<8x8xf32>
    %70 = arith.truncf %67 : vector<8x8xf32> to vector<8x8xbf16>
    %71 = arith.truncf %68 : vector<8x8xf32> to vector<8x8xbf16>
    %cst_24 = arith.constant dense<0.000000e+00> : vector<8x8xf32>
    %72 = tpu.matmul %70, %71, %cst_24 {dimension_numbers = #tpu.dot_dimension_numbers<[1], [1], [0], [0], [0, 0, 1, 0], [], []>} : vector<8x8xbf16>, vector<8x8xbf16>, vector<8x8xf32> -> vector<8x8xf32>
    %cst_25 = arith.constant 0.353553385 : f32
    %73 = vector.broadcast %cst_25 : f32 to vector<8x8xf32>
    %74 = arith.mulf %72, %73 : vector<8x8xf32>
    %75 = vector.broadcast %3 : vector<1x8xf32> to vector<8x8xf32>
    %76 = arith.addf %74, %75 : vector<8x8xf32>
    %cst_26 = arith.constant dense<0xFF800000> : vector<8xf32>
    %77 = vector.multi_reduction <maximumf>, %76, %cst_26 [1] : vector<8x8xf32> to vector<8xf32>
    %78 = vector.shape_cast %77 : vector<8xf32> to vector<8x1xf32>
    %79 = vector.broadcast %78 : vector<8x1xf32> to vector<8x8xf32>
    %80 = arith.subf %76, %79 : vector<8x8xf32>
    %81 = math.exp %80 : vector<8x8xf32>
    %cst_27 = arith.constant dense<0.000000e+00> : vector<8xf32>
    %82 = vector.multi_reduction <add>, %81, %cst_27 [1] : vector<8x8xf32> to vector<8xf32>
    %83 = vector.shape_cast %82 : vector<8xf32> to vector<8x1xf32>
    %84 = vector.broadcast %83 : vector<8x1xf32> to vector<8x8xf32>
    %85 = arith.divf %81, %84 : vector<8x8xf32>
    %86 = arith.truncf %85 : vector<8x8xf32> to vector<8x8xbf16>
    %87 = arith.truncf %69 : vector<8x8xf32> to vector<8x8xbf16>
    %cst_28 = arith.constant dense<0.000000e+00> : vector<8x8xf32>
    %88 = tpu.matmul %86, %87, %cst_28 {dimension_numbers = #tpu.dot_dimension_numbers<[1], [0], [0], [1], [0, 0, 1, 1], [], []>} : vector<8x8xbf16>, vector<8x8xbf16>, vector<8x8xf32> -> vector<8x8xf32>
    %89 = vector.extract_strided_slice %11 {offsets = [16, 0], sizes = [8, 32], strides = [1, 1]} : vector<32x32xf32> to vector<8x32xf32>
    %90 = arith.truncf %88 : vector<8x8xf32> to vector<8x8xbf16>
    %91 = arith.truncf %89 : vector<8x32xf32> to vector<8x32xbf16>
    %cst_29 = arith.constant dense<0.000000e+00> : vector<8x32xf32>
    %92 = tpu.matmul %90, %91, %cst_29 {dimension_numbers = #tpu.dot_dimension_numbers<[1], [0], [0], [1], [0, 0, 1, 1], [], []>} : vector<8x8xbf16>, vector<8x32xbf16>, vector<8x32xf32> -> vector<8x32xf32>
    %93 = arith.addf %66, %92 : vector<8x32xf32>
    %94 = vector.extract_strided_slice %10 {offsets = [0, 24], sizes = [8, 8], strides = [1, 1]} : vector<8x96xf32> to vector<8x8xf32>
    %95 = vector.extract_strided_slice %10 {offsets = [0, 56], sizes = [8, 8], strides = [1, 1]} : vector<8x96xf32> to vector<8x8xf32>
    %96 = vector.extract_strided_slice %10 {offsets = [0, 88], sizes = [8, 8], strides = [1, 1]} : vector<8x96xf32> to vector<8x8xf32>
    %97 = arith.truncf %94 : vector<8x8xf32> to vector<8x8xbf16>
    %98 = arith.truncf %95 : vector<8x8xf32> to vector<8x8xbf16>
    %cst_30 = arith.constant dense<0.000000e+00> : vector<8x8xf32>
    %99 = tpu.matmul %97, %98, %cst_30 {dimension_numbers = #tpu.dot_dimension_numbers<[1], [1], [0], [0], [0, 0, 1, 0], [], []>} : vector<8x8xbf16>, vector<8x8xbf16>, vector<8x8xf32> -> vector<8x8xf32>
    %cst_31 = arith.constant 0.353553385 : f32
    %100 = vector.broadcast %cst_31 : f32 to vector<8x8xf32>
    %101 = arith.mulf %99, %100 : vector<8x8xf32>
    %102 = vector.broadcast %3 : vector<1x8xf32> to vector<8x8xf32>
    %103 = arith.addf %101, %102 : vector<8x8xf32>
    %cst_32 = arith.constant dense<0xFF800000> : vector<8xf32>
    %104 = vector.multi_reduction <maximumf>, %103, %cst_32 [1] : vector<8x8xf32> to vector<8xf32>
    %105 = vector.shape_cast %104 : vector<8xf32> to vector<8x1xf32>
    %106 = vector.broadcast %105 : vector<8x1xf32> to vector<8x8xf32>
    %107 = arith.subf %103, %106 : vector<8x8xf32>
    %108 = math.exp %107 : vector<8x8xf32>
    %cst_33 = arith.constant dense<0.000000e+00> : vector<8xf32>
    %109 = vector.multi_reduction <add>, %108, %cst_33 [1] : vector<8x8xf32> to vector<8xf32>
    %110 = vector.shape_cast %109 : vector<8xf32> to vector<8x1xf32>
    %111 = vector.broadcast %110 : vector<8x1xf32> to vector<8x8xf32>
    %112 = arith.divf %108, %111 : vector<8x8xf32>
    %113 = arith.truncf %112 : vector<8x8xf32> to vector<8x8xbf16>
    %114 = arith.truncf %96 : vector<8x8xf32> to vector<8x8xbf16>
    %cst_34 = arith.constant dense<0.000000e+00> : vector<8x8xf32>
    %115 = tpu.matmul %113, %114, %cst_34 {dimension_numbers = #tpu.dot_dimension_numbers<[1], [0], [0], [1], [0, 0, 1, 1], [], []>} : vector<8x8xbf16>, vector<8x8xbf16>, vector<8x8xf32> -> vector<8x8xf32>
    %116 = vector.extract_strided_slice %11 {offsets = [24, 0], sizes = [8, 32], strides = [1, 1]} : vector<32x32xf32> to vector<8x32xf32>
    %117 = arith.truncf %115 : vector<8x8xf32> to vector<8x8xbf16>
    %118 = arith.truncf %116 : vector<8x32xf32> to vector<8x32xbf16>
    %cst_35 = arith.constant dense<0.000000e+00> : vector<8x32xf32>
    %119 = tpu.matmul %117, %118, %cst_35 {dimension_numbers = #tpu.dot_dimension_numbers<[1], [0], [0], [1], [0, 0, 1, 1], [], []>} : vector<8x8xbf16>, vector<8x32xbf16>, vector<8x32xf32> -> vector<8x32xf32>
    %120 = arith.addf %93, %119 : vector<8x32xf32>
    %c0_36 = arith.constant 0 : index
    %c0_37 = arith.constant 0 : index
    %121 = vector.load %arg6[%c0_36, %c0_37] : memref<1x32xf32, #tpu.memory_space<vmem>>, vector<1x32xf32>
    %122 = vector.broadcast %121 : vector<1x32xf32> to vector<8x32xf32>
    %123 = arith.addf %120, %122 : vector<8x32xf32>
    %124 = arith.addf %1, %123 : vector<8x32xf32>
    %c0_38 = arith.constant 0 : index
    %c0_39 = arith.constant 0 : index
    %125 = vector.load %arg7[%c0_38, %c0_39] : memref<1x32xf32, #tpu.memory_space<vmem>>, vector<1x32xf32>
    %c0_40 = arith.constant 0 : index
    %c0_41 = arith.constant 0 : index
    %126 = vector.load %arg8[%c0_40, %c0_41] : memref<1x32xf32, #tpu.memory_space<vmem>>, vector<1x32xf32>
    %cst_42 = arith.constant dense<0.000000e+00> : vector<8xf32>
    %127 = vector.multi_reduction <add>, %124, %cst_42 [1] : vector<8x32xf32> to vector<8xf32>
    %128 = vector.shape_cast %127 : vector<8xf32> to vector<8x1xf32>
    %cst_43 = arith.constant 3.200000e+01 : f32
    %129 = vector.broadcast %cst_43 : f32 to vector<8x1xf32>
    %130 = arith.divf %128, %129 : vector<8x1xf32>
    %131 = vector.broadcast %130 : vector<8x1xf32> to vector<8x32xf32>
    %132 = arith.subf %124, %131 : vector<8x32xf32>
    %133 = arith.mulf %132, %132 : vector<8x32xf32>
    %cst_44 = arith.constant dense<0.000000e+00> : vector<8xf32>
    %134 = vector.multi_reduction <add>, %133, %cst_44 [1] : vector<8x32xf32> to vector<8xf32>
    %135 = vector.shape_cast %134 : vector<8xf32> to vector<8x1xf32>
    %cst_45 = arith.constant 3.200000e+01 : f32
    %136 = vector.broadcast %cst_45 : f32 to vector<8x1xf32>
    %137 = arith.divf %135, %136 : vector<8x1xf32>
    %138 = vector.broadcast %130 : vector<8x1xf32> to vector<8x32xf32>
    %139 = arith.subf %124, %138 : vector<8x32xf32>
    %cst_46 = arith.constant 9.99999974E-6 : f32
    %140 = vector.broadcast %cst_46 : f32 to vector<8x1xf32>
    %141 = arith.addf %137, %140 : vector<8x1xf32>
    %142 = math.rsqrt %141 : vector<8x1xf32>
    %143 = vector.broadcast %142 : vector<8x1xf32> to vector<8x32xf32>
    %144 = arith.mulf %139, %143 : vector<8x32xf32>
    %145 = vector.broadcast %125 : vector<1x32xf32> to vector<8x32xf32>
    %146 = arith.mulf %144, %145 : vector<8x32xf32>
    %147 = vector.broadcast %126 : vector<1x32xf32> to vector<8x32xf32>
    %148 = arith.addf %146, %147 : vector<8x32xf32>
    %c0_47 = arith.constant 0 : index
    %c0_48 = arith.constant 0 : index
    %149 = vector.load %arg9[%c0_47, %c0_48] : memref<32x128xf32, #tpu.memory_space<vmem>>, vector<32x128xf32>
    %150 = arith.truncf %148 : vector<8x32xf32> to vector<8x32xbf16>
    %151 = arith.truncf %149 : vector<32x128xf32> to vector<32x128xbf16>
    %cst_49 = arith.constant dense<0.000000e+00> : vector<8x128xf32>
    %152 = tpu.matmul %150, %151, %cst_49 {dimension_numbers = #tpu.dot_dimension_numbers<[1], [0], [0], [1], [0, 0, 1, 1], [], []>} : vector<8x32xbf16>, vector<32x128xbf16>, vector<8x128xf32> -> vector<8x128xf32>
    %c0_50 = arith.constant 0 : index
    %c0_51 = arith.constant 0 : index
    %153 = vector.load %arg10[%c0_50, %c0_51] : memref<1x128xf32, #tpu.memory_space<vmem>>, vector<1x128xf32>
    %154 = vector.broadcast %153 : vector<1x128xf32> to vector<8x128xf32>
    %155 = arith.addf %152, %154 : vector<8x128xf32>
    %cst_52 = arith.constant 0.000000e+00 : f32
    %156 = vector.broadcast %cst_52 : f32 to vector<8x128xf32>
    %157 = arith.maximumf %155, %156 : vector<8x128xf32>
    %c0_53 = arith.constant 0 : index
    %c0_54 = arith.constant 0 : index
    %158 = vector.load %arg11[%c0_53, %c0_54] : memref<128x32xf32, #tpu.memory_space<vmem>>, vector<128x32xf32>
    %159 = arith.truncf %157 : vector<8x128xf32> to vector<8x128xbf16>
    %160 = arith.truncf %158 : vector<128x32xf32> to vector<128x32xbf16>
    %cst_55 = arith.constant dense<0.000000e+00> : vector<8x32xf32>
    %161 = tpu.matmul %159, %160, %cst_55 {dimension_numbers = #tpu.dot_dimension_numbers<[1], [0], [0], [1], [0, 0, 1, 1], [], []>} : vector<8x128xbf16>, vector<128x32xbf16>, vector<8x32xf32> -> vector<8x32xf32>
    %c0_56 = arith.constant 0 : index
    %c0_57 = arith.constant 0 : index
    %162 = vector.load %arg12[%c0_56, %c0_57] : memref<1x32xf32, #tpu.memory_space<vmem>>, vector<1x32xf32>
    %163 = vector.broadcast %162 : vector<1x32xf32> to vector<8x32xf32>
    %164 = arith.addf %161, %163 : vector<8x32xf32>
    %165 = arith.addf %148, %164 : vector<8x32xf32>
    %c0_58 = arith.constant 0 : index
    %c0_59 = arith.constant 0 : index
    %166 = vector.load %arg13[%c0_58, %c0_59] : memref<1x32xf32, #tpu.memory_space<vmem>>, vector<1x32xf32>
    %c0_60 = arith.constant 0 : index
    %c0_61 = arith.constant 0 : index
    %167 = vector.load %arg14[%c0_60, %c0_61] : memref<1x32xf32, #tpu.memory_space<vmem>>, vector<1x32xf32>
    %cst_62 = arith.constant dense<0.000000e+00> : vector<8xf32>
    %168 = vector.multi_reduction <add>, %165, %cst_62 [1] : vector<8x32xf32> to vector<8xf32>
    %169 = vector.shape_cast %168 : vector<8xf32> to vector<8x1xf32>
    %cst_63 = arith.constant 3.200000e+01 : f32
    %170 = vector.broadcast %cst_63 : f32 to vector<8x1xf32>
    %171 = arith.divf %169, %170 : vector<8x1xf32>
    %172 = vector.broadcast %171 : vector<8x1xf32> to vector<8x32xf32>
    %173 = arith.subf %165, %172 : vector<8x32xf32>
    %174 = arith.mulf %173, %173 : vector<8x32xf32>
    %cst_64 = arith.constant dense<0.000000e+00> : vector<8xf32>
    %175 = vector.multi_reduction <add>, %174, %cst_64 [1] : vector<8x32xf32> to vector<8xf32>
    %176 = vector.shape_cast %175 : vector<8xf32> to vector<8x1xf32>
    %cst_65 = arith.constant 3.200000e+01 : f32
    %177 = vector.broadcast %cst_65 : f32 to vector<8x1xf32>
    %178 = arith.divf %176, %177 : vector<8x1xf32>
    %179 = vector.broadcast %171 : vector<8x1xf32> to vector<8x32xf32>
    %180 = arith.subf %165, %179 : vector<8x32xf32>
    %cst_66 = arith.constant 9.99999974E-6 : f32
    %181 = vector.broadcast %cst_66 : f32 to vector<8x1xf32>
    %182 = arith.addf %178, %181 : vector<8x1xf32>
    %183 = math.rsqrt %182 : vector<8x1xf32>
    %184 = vector.broadcast %183 : vector<8x1xf32> to vector<8x32xf32>
    %185 = arith.mulf %180, %184 : vector<8x32xf32>
    %186 = vector.broadcast %166 : vector<1x32xf32> to vector<8x32xf32>
    %187 = arith.mulf %185, %186 : vector<8x32xf32>
    %188 = vector.broadcast %167 : vector<1x32xf32> to vector<8x32xf32>
    %189 = arith.addf %187, %188 : vector<8x32xf32>
    %c0_67 = arith.constant 0 : index
    %c0_68 = arith.constant 0 : index
    %c0_69 = arith.constant 0 : index
    %190 = vector.load %arg15[%c0_67, %c0_68, %c0_69] : memref<1x8x32xf32, #tpu.memory_space<vmem>>, vector<1x8x32xf32>
    %191 = vector.shape_cast %190 : vector<1x8x32xf32> to vector<8x32xf32>
    %192 = vector.shape_cast %189 : vector<8x32xf32> to vector<1x8x32xf32>
    tpu.vector_store %arg15[%c0_67, %c0_68, %c0_69], %192 {strides = array<i32>} : memref<1x8x32xf32, #tpu.memory_space<vmem>>, vector<1x8x32xf32>,
    return
  }
  func.func @transform_0(%arg0: i32) -> (i32, i32, i32) {
    %c0_i32 = arith.constant 0 : i32
    %c0_i32_0 = arith.constant 0 : i32
    %c0_i32_1 = arith.constant 0 : i32
    return %arg0, %c0_i32, %c0_i32_0 : i32, i32, i32
  }
  func.func @transform_1(%arg0: i32) -> (i32, i32, i32) {
    %c0_i32 = arith.constant 0 : i32
    %c0_i32_0 = arith.constant 0 : i32
    %c0_i32_1 = arith.constant 0 : i32
    return %arg0, %c0_i32, %c0_i32_0 : i32, i32, i32
  }
  func.func @transform_2(%arg0: i32) -> (i32, i32) {
    %c0_i32 = arith.constant 0 : i32
    %c0_i32_0 = arith.constant 0 : i32
    %c0_i32_1 = arith.constant 0 : i32
    return %c0_i32, %c0_i32_0 : i32, i32
  }
  func.func @transform_3(%arg0: i32) -> (i32, i32) {
    %c0_i32 = arith.constant 0 : i32
    %c0_i32_0 = arith.constant 0 : i32
    %c0_i32_1 = arith.constant 0 : i32
    return %c0_i32, %c0_i32_0 : i32, i32
  }
  func.func @transform_4(%arg0: i32) -> (i32, i32) {
    %c0_i32 = arith.constant 0 : i32
    %c0_i32_0 = arith.constant 0 : i32
    %c0_i32_1 = arith.constant 0 : i32
    return %c0_i32, %c0_i32_0 : i32, i32
  }
  func.func @transform_5(%arg0: i32) -> (i32, i32) {
    %c0_i32 = arith.constant 0 : i32
    %c0_i32_0 = arith.constant 0 : i32
    %c0_i32_1 = arith.constant 0 : i32
    return %c0_i32, %c0_i32_0 : i32, i32
  }
  func.func @transform_6(%arg0: i32) -> (i32, i32) {
    %c0_i32 = arith.constant 0 : i32
    %c0_i32_0 = arith.constant 0 : i32
    %c0_i32_1 = arith.constant 0 : i32
    return %c0_i32, %c0_i32_0 : i32, i32
  }
  func.func @transform_7(%arg0: i32) -> (i32, i32) {
    %c0_i32 = arith.constant 0 : i32
    %c0_i32_0 = arith.constant 0 : i32
    %c0_i32_1 = arith.constant 0 : i32
    return %c0_i32, %c0_i32_0 : i32, i32
  }
  func.func @transform_8(%arg0: i32) -> (i32, i32) {
    %c0_i32 = arith.constant 0 : i32
    %c0_i32_0 = arith.constant 0 : i32
    %c0_i32_1 = arith.constant 0 : i32
    return %c0_i32, %c0_i32_0 : i32, i32
  }
  func.func @transform_9(%arg0: i32) -> (i32, i32) {
    %c0_i32 = arith.constant 0 : i32
    %c0_i32_0 = arith.constant 0 : i32
    %c0_i32_1 = arith.constant 0 : i32
    return %c0_i32, %c0_i32_0 : i32, i32
  }
  func.func @transform_10(%arg0: i32) -> (i32, i32) {
    %c0_i32 = arith.constant 0 : i32
    %c0_i32_0 = arith.constant 0 : i32
    %c0_i32_1 = arith.constant 0 : i32
    return %c0_i32, %c0_i32_0 : i32, i32
  }
  func.func @transform_11(%arg0: i32) -> (i32, i32) {
    %c0_i32 = arith.constant 0 : i32
    %c0_i32_0 = arith.constant 0 : i32
    %c0_i32_1 = arith.constant 0 : i32
    return %c0_i32, %c0_i32_0 : i32, i32
  }
  func.func @transform_12(%arg0: i32) -> (i32, i32) {
    %c0_i32 = arith.constant 0 : i32
    %c0_i32_0 = arith.constant 0 : i32
    %c0_i32_1 = arith.constant 0 : i32
    return %c0_i32, %c0_i32_0 : i32, i32
  }
  func.func @transform_13(%arg0: i32) -> (i32, i32) {
    %c0_i32 = arith.constant 0 : i32
    %c0_i32_0 = arith.constant 0 : i32
    %c0_i32_1 = arith.constant 0 : i32
    return %c0_i32, %c0_i32_0 : i32, i32
  }
  func.func @transform_14(%arg0: i32) -> (i32, i32, i32) {
    %c0_i32 = arith.constant 0 : i32
    %c0_i32_0 = arith.constant 0 : i32
    %c0_i32_1 = arith.constant 0 : i32
    return %arg0, %c0_i32, %c0_i32_0 : i32, i32, i32
  }
}

module attributes {stable_mosaic.version = 11 : i64} {
  func.func @_head_kernel(%arg0: i32, %arg1: memref<2x8x32xf32, #tpu.memory_space<vmem>>, %arg2: memref<2x8xf32, #tpu.memory_space<vmem>>, %arg3: memref<2x99xf32, #tpu.memory_space<vmem>>, %arg4: memref<99x64xf32, #tpu.memory_space<vmem>>, %arg5: memref<1x64xf32, #tpu.memory_space<vmem>>, %arg6: memref<1x64xf32, #tpu.memory_space<vmem>>, %arg7: memref<1x64xf32, #tpu.memory_space<vmem>>, %arg8: memref<96x64xf32, #tpu.memory_space<vmem>>, %arg9: memref<1x64xf32, #tpu.memory_space<vmem>>, %arg10: memref<64x1xf32, #tpu.memory_space<vmem>>, %arg11: memref<1x1xf32, #tpu.memory_space<vmem>>, %arg12: memref<2x1xf32, #tpu.memory_space<vmem>>) attributes {dimension_semantics = [#tpu.dimension_semantics<arbitrary>], iteration_bounds = array<i64: 1>, scalar_prefetch = 0 : i64, scratch_operands = 0 : i64, tpu.core_type = #tpu.core_type<tc>, window_params = [{pipeline_mode = #tpu.pipeline_mode<synchronous>, transform_indices = @transform_0, window_bounds = array<i64: 2, 8, 32>}, {pipeline_mode = #tpu.pipeline_mode<synchronous>, transform_indices = @transform_1, window_bounds = array<i64: 2, 8>}, {pipeline_mode = #tpu.pipeline_mode<synchronous>, transform_indices = @transform_2, window_bounds = array<i64: 2, 99>}, {pipeline_mode = #tpu.pipeline_mode<synchronous>, transform_indices = @transform_3, window_bounds = array<i64: 99, 64>}, {pipeline_mode = #tpu.pipeline_mode<synchronous>, transform_indices = @transform_4, window_bounds = array<i64: 1, 64>}, {pipeline_mode = #tpu.pipeline_mode<synchronous>, transform_indices = @transform_5, window_bounds = array<i64: 1, 64>}, {pipeline_mode = #tpu.pipeline_mode<synchronous>, transform_indices = @transform_6, window_bounds = array<i64: 1, 64>}, {pipeline_mode = #tpu.pipeline_mode<synchronous>, transform_indices = @transform_7, window_bounds = array<i64: 96, 64>}, {pipeline_mode = #tpu.pipeline_mode<synchronous>, transform_indices = @transform_8, window_bounds = array<i64: 1, 64>}, {pipeline_mode = #tpu.pipeline_mode<synchronous>, transform_indices = @transform_9, window_bounds = array<i64: 64, 1>}, {pipeline_mode = #tpu.pipeline_mode<synchronous>, transform_indices = @transform_10, window_bounds = array<i64: 1, 1>}, {pipeline_mode = #tpu.pipeline_mode<synchronous>, transform_indices = @transform_11, window_bounds = array<i64: 2, 1>}]} {
    %c0 = arith.constant 0 : index
    %c0_0 = arith.constant 0 : index
    %c0_1 = arith.constant 0 : index
    %0 = vector.load %arg1[%c0, %c0_0, %c0_1] : memref<2x8x32xf32, #tpu.memory_space<vmem>>, vector<2x8x32xf32>
    %c0_2 = arith.constant 0 : index
    %c0_3 = arith.constant 0 : index
    %1 = vector.load %arg2[%c0_2, %c0_3] : memref<2x8xf32, #tpu.memory_space<vmem>>, vector<2x8xf32>
    %2 = vector.shape_cast %1 : vector<2x8xf32> to vector<2x8x1xf32>
    %3 = vector.broadcast %2 : vector<2x8x1xf32> to vector<2x8x32xf32>
    %4 = arith.mulf %0, %3 : vector<2x8x32xf32>
    %cst = arith.constant dense<0.000000e+00> : vector<2xf32>
    %5 = vector.multi_reduction <add>, %1, %cst [1] : vector<2x8xf32> to vector<2xf32>
    %6 = vector.shape_cast %5 : vector<2xf32> to vector<2x1xf32>
    %cst_4 = arith.constant 9.99999971E-10 : f32
    %7 = vector.broadcast %cst_4 : f32 to vector<2x1xf32>
    %8 = arith.maximumf %6, %7 : vector<2x1xf32>
    %cst_5 = arith.constant dense<0.000000e+00> : vector<2x32xf32>
    %9 = vector.multi_reduction <add>, %4, %cst_5 [1] : vector<2x8x32xf32> to vector<2x32xf32>
    %10 = vector.broadcast %8 : vector<2x1xf32> to vector<2x32xf32>
    %11 = arith.divf %9, %10 : vector<2x32xf32>
    %c0_6 = arith.constant 0 : index
    %c0_7 = arith.constant 0 : index
    %12 = vector.load %arg3[%c0_6, %c0_7] : memref<2x99xf32, #tpu.memory_space<vmem>>, vector<2x99xf32>
    %c0_8 = arith.constant 0 : index
    %c0_9 = arith.constant 0 : index
    %13 = vector.load %arg4[%c0_8, %c0_9] : memref<99x64xf32, #tpu.memory_space<vmem>>, vector<99x64xf32>
    %14 = arith.truncf %12 : vector<2x99xf32> to vector<2x99xbf16>
    %15 = arith.truncf %13 : vector<99x64xf32> to vector<99x64xbf16>
    %cst_10 = arith.constant dense<0.000000e+00> : vector<2x64xf32>
    %16 = tpu.matmul %14, %15, %cst_10 {dimension_numbers = #tpu.dot_dimension_numbers<[1], [0], [0], [1], [0, 0, 1, 1], [], []>} : vector<2x99xbf16>, vector<99x64xbf16>, vector<2x64xf32> -> vector<2x64xf32>
    %c0_11 = arith.constant 0 : index
    %c0_12 = arith.constant 0 : index
    %17 = vector.load %arg5[%c0_11, %c0_12] : memref<1x64xf32, #tpu.memory_space<vmem>>, vector<1x64xf32>
    %18 = vector.broadcast %17 : vector<1x64xf32> to vector<2x64xf32>
    %19 = arith.addf %16, %18 : vector<2x64xf32>
    %cst_13 = arith.constant 0.000000e+00 : f32
    %20 = vector.broadcast %cst_13 : f32 to vector<2x64xf32>
    %21 = arith.maximumf %19, %20 : vector<2x64xf32>
    %c0_14 = arith.constant 0 : index
    %c0_15 = arith.constant 0 : index
    %22 = vector.load %arg6[%c0_14, %c0_15] : memref<1x64xf32, #tpu.memory_space<vmem>>, vector<1x64xf32>
    %c0_16 = arith.constant 0 : index
    %c0_17 = arith.constant 0 : index
    %23 = vector.load %arg7[%c0_16, %c0_17] : memref<1x64xf32, #tpu.memory_space<vmem>>, vector<1x64xf32>
    %cst_18 = arith.constant dense<0.000000e+00> : vector<2xf32>
    %24 = vector.multi_reduction <add>, %21, %cst_18 [1] : vector<2x64xf32> to vector<2xf32>
    %25 = vector.shape_cast %24 : vector<2xf32> to vector<2x1xf32>
    %cst_19 = arith.constant 6.400000e+01 : f32
    %26 = vector.broadcast %cst_19 : f32 to vector<2x1xf32>
    %27 = arith.divf %25, %26 : vector<2x1xf32>
    %28 = vector.broadcast %27 : vector<2x1xf32> to vector<2x64xf32>
    %29 = arith.subf %21, %28 : vector<2x64xf32>
    %30 = arith.mulf %29, %29 : vector<2x64xf32>
    %cst_20 = arith.constant dense<0.000000e+00> : vector<2xf32>
    %31 = vector.multi_reduction <add>, %30, %cst_20 [1] : vector<2x64xf32> to vector<2xf32>
    %32 = vector.shape_cast %31 : vector<2xf32> to vector<2x1xf32>
    %cst_21 = arith.constant 6.400000e+01 : f32
    %33 = vector.broadcast %cst_21 : f32 to vector<2x1xf32>
    %34 = arith.divf %32, %33 : vector<2x1xf32>
    %35 = vector.broadcast %27 : vector<2x1xf32> to vector<2x64xf32>
    %36 = arith.subf %21, %35 : vector<2x64xf32>
    %cst_22 = arith.constant 9.99999974E-6 : f32
    %37 = vector.broadcast %cst_22 : f32 to vector<2x1xf32>
    %38 = arith.addf %34, %37 : vector<2x1xf32>
    %39 = math.rsqrt %38 : vector<2x1xf32>
    %40 = vector.broadcast %39 : vector<2x1xf32> to vector<2x64xf32>
    %41 = arith.mulf %36, %40 : vector<2x64xf32>
    %42 = vector.broadcast %22 : vector<1x64xf32> to vector<2x64xf32>
    %43 = arith.mulf %41, %42 : vector<2x64xf32>
    %44 = vector.broadcast %23 : vector<1x64xf32> to vector<2x64xf32>
    %45 = arith.addf %43, %44 : vector<2x64xf32>
    %c0_23 = arith.constant 0 : index
    %c0_24 = arith.constant 0 : index
    %46 = vector.load %arg8[%c0_23, %c0_24] : memref<96x64xf32, #tpu.memory_space<vmem>>, vector<32x64xf32>
    %47 = arith.truncf %11 : vector<2x32xf32> to vector<2x32xbf16>
    %48 = arith.truncf %46 : vector<32x64xf32> to vector<32x64xbf16>
    %cst_25 = arith.constant dense<0.000000e+00> : vector<2x64xf32>
    %49 = tpu.matmul %47, %48, %cst_25 {dimension_numbers = #tpu.dot_dimension_numbers<[1], [0], [0], [1], [0, 0, 1, 1], [], []>} : vector<2x32xbf16>, vector<32x64xbf16>, vector<2x64xf32> -> vector<2x64xf32>
    %c32 = arith.constant 32 : index
    %c0_26 = arith.constant 0 : index
    %50 = vector.load %arg8[%c32, %c0_26] : memref<96x64xf32, #tpu.memory_space<vmem>>, vector<64x64xf32>
    %51 = arith.truncf %45 : vector<2x64xf32> to vector<2x64xbf16>
    %52 = arith.truncf %50 : vector<64x64xf32> to vector<64x64xbf16>
    %cst_27 = arith.constant dense<0.000000e+00> : vector<2x64xf32>
    %53 = tpu.matmul %51, %52, %cst_27 {dimension_numbers = #tpu.dot_dimension_numbers<[1], [0], [0], [1], [0, 0, 1, 1], [], []>} : vector<2x64xbf16>, vector<64x64xbf16>, vector<2x64xf32> -> vector<2x64xf32>
    %54 = arith.addf %49, %53 : vector<2x64xf32>
    %c0_28 = arith.constant 0 : index
    %c0_29 = arith.constant 0 : index
    %55 = vector.load %arg9[%c0_28, %c0_29] : memref<1x64xf32, #tpu.memory_space<vmem>>, vector<1x64xf32>
    %56 = vector.broadcast %55 : vector<1x64xf32> to vector<2x64xf32>
    %57 = arith.addf %54, %56 : vector<2x64xf32>
    %cst_30 = arith.constant 0.000000e+00 : f32
    %58 = vector.broadcast %cst_30 : f32 to vector<2x64xf32>
    %59 = arith.maximumf %57, %58 : vector<2x64xf32>
    %c0_31 = arith.constant 0 : index
    %c0_32 = arith.constant 0 : index
    %60 = vector.load %arg10[%c0_31, %c0_32] : memref<64x1xf32, #tpu.memory_space<vmem>>, vector<64x1xf32>
    %61 = arith.truncf %59 : vector<2x64xf32> to vector<2x64xbf16>
    %62 = arith.truncf %60 : vector<64x1xf32> to vector<64x1xbf16>
    %cst_33 = arith.constant dense<0.000000e+00> : vector<2x1xf32>
    %63 = tpu.matmul %61, %62, %cst_33 {dimension_numbers = #tpu.dot_dimension_numbers<[1], [0], [0], [1], [0, 0, 1, 1], [], []>} : vector<2x64xbf16>, vector<64x1xbf16>, vector<2x1xf32> -> vector<2x1xf32>
    %c0_34 = arith.constant 0 : index
    %c0_35 = arith.constant 0 : index
    %64 = vector.load %arg11[%c0_34, %c0_35] : memref<1x1xf32, #tpu.memory_space<vmem>>, vector<1x1xf32>
    %65 = vector.broadcast %64 : vector<1x1xf32> to vector<2x1xf32>
    %66 = arith.addf %63, %65 : vector<2x1xf32>
    %c0_36 = arith.constant 0 : index
    %c0_37 = arith.constant 0 : index
    %67 = vector.load %arg12[%c0_36, %c0_37] : memref<2x1xf32, #tpu.memory_space<vmem>>, vector<2x1xf32>
    tpu.vector_store %arg12[%c0_36, %c0_37], %66 {strides = array<i32>} : memref<2x1xf32, #tpu.memory_space<vmem>>, vector<2x1xf32>,
    return
  }
  func.func @transform_0(%arg0: i32) -> (i32, i32, i32) {
    %c0_i32 = arith.constant 0 : i32
    %c0_i32_0 = arith.constant 0 : i32
    %c0_i32_1 = arith.constant 0 : i32
    %c0_i32_2 = arith.constant 0 : i32
    return %c0_i32, %c0_i32_0, %c0_i32_1 : i32, i32, i32
  }
  func.func @transform_1(%arg0: i32) -> (i32, i32) {
    %c0_i32 = arith.constant 0 : i32
    %c0_i32_0 = arith.constant 0 : i32
    %c0_i32_1 = arith.constant 0 : i32
    return %c0_i32, %c0_i32_0 : i32, i32
  }
  func.func @transform_2(%arg0: i32) -> (i32, i32) {
    %c0_i32 = arith.constant 0 : i32
    %c0_i32_0 = arith.constant 0 : i32
    %c0_i32_1 = arith.constant 0 : i32
    return %c0_i32, %c0_i32_0 : i32, i32
  }
  func.func @transform_3(%arg0: i32) -> (i32, i32) {
    %c0_i32 = arith.constant 0 : i32
    %c0_i32_0 = arith.constant 0 : i32
    %c0_i32_1 = arith.constant 0 : i32
    return %c0_i32, %c0_i32_0 : i32, i32
  }
  func.func @transform_4(%arg0: i32) -> (i32, i32) {
    %c0_i32 = arith.constant 0 : i32
    %c0_i32_0 = arith.constant 0 : i32
    %c0_i32_1 = arith.constant 0 : i32
    return %c0_i32, %c0_i32_0 : i32, i32
  }
  func.func @transform_5(%arg0: i32) -> (i32, i32) {
    %c0_i32 = arith.constant 0 : i32
    %c0_i32_0 = arith.constant 0 : i32
    %c0_i32_1 = arith.constant 0 : i32
    return %c0_i32, %c0_i32_0 : i32, i32
  }
  func.func @transform_6(%arg0: i32) -> (i32, i32) {
    %c0_i32 = arith.constant 0 : i32
    %c0_i32_0 = arith.constant 0 : i32
    %c0_i32_1 = arith.constant 0 : i32
    return %c0_i32, %c0_i32_0 : i32, i32
  }
  func.func @transform_7(%arg0: i32) -> (i32, i32) {
    %c0_i32 = arith.constant 0 : i32
    %c0_i32_0 = arith.constant 0 : i32
    %c0_i32_1 = arith.constant 0 : i32
    return %c0_i32, %c0_i32_0 : i32, i32
  }
  func.func @transform_8(%arg0: i32) -> (i32, i32) {
    %c0_i32 = arith.constant 0 : i32
    %c0_i32_0 = arith.constant 0 : i32
    %c0_i32_1 = arith.constant 0 : i32
    return %c0_i32, %c0_i32_0 : i32, i32
  }
  func.func @transform_9(%arg0: i32) -> (i32, i32) {
    %c0_i32 = arith.constant 0 : i32
    %c0_i32_0 = arith.constant 0 : i32
    %c0_i32_1 = arith.constant 0 : i32
    return %c0_i32, %c0_i32_0 : i32, i32
  }
  func.func @transform_10(%arg0: i32) -> (i32, i32) {
    %c0_i32 = arith.constant 0 : i32
    %c0_i32_0 = arith.constant 0 : i32
    %c0_i32_1 = arith.constant 0 : i32
    return %c0_i32, %c0_i32_0 : i32, i32
  }
  func.func @transform_11(%arg0: i32) -> (i32, i32) {
    %c0_i32 = arith.constant 0 : i32
    %c0_i32_0 = arith.constant 0 : i32
    %c0_i32_1 = arith.constant 0 : i32
    return %c0_i32, %c0_i32_0 : i32, i32
  }
}

</mosaic_0001>

<bundles_post_ra>
// kernel: forward.4
= control target key start
LH: loop header
LB: loop body
LE: loop exit
PB: predicated region body
PF: predicated region fallthrough
CT: control target
= control target key end

     0   :  { %s470_s21 = smov 0   ;;  %s515_s0 = inlined_call_operand.vmem [shape: f32[2,8,16], index: 0, kind: input, shape index: {}]   ;;  %s516_s1 = inlined_call_operand.vmem [shape: f32[8,32], index: 1, kind: input, shape index: {}]   ;;  %s517_s2 = inlined_call_operand.vmem [shape: f32[16,32], index: 2, kind: input, shape index: {}]   ;;  %s518_s3 = inlined_call_operand.vmem [shape: f32[1,32], index: 3, kind: input, shape index: {}]   ;;  %s519_s4 = inlined_call_operand.vmem [shape: f32[1,32], index: 4, kind: input, shape index: {}]   ;;  %s520_s5 = inlined_call_operand.vmem [shape: f32[1,32], index: 5, kind: input, shape index: {}]   ;;  %s521_s6 = inlined_call_operand.vmem [shape: f32[2,8,32], index: 6, kind: output, shape index: {}]  }
   0x1 LB: > { %s392_s22 = sadd.s32 4294967295, %s431_s21   ;;  %p396_p0 = scmp.ge.s32.totalorder %s431_s21, 1  ;;  %s431_s21 = sphi %s470_s21, %s16_s21  }
   0x2   : > { %p211_p1 = scmp.lt.s32.totalorder %s431_s21, 3 }
   0x4   : > { %p212_p2 = pnand %p396_p0, %p211_p1 }
   0x5   : > { %v249_v0 = vld [vmem:[%s517_s2] sm:$0xff] (!%p212_p2)  ;;  %v250_v1 = vld [vmem:[%s517_s2 + $0x8] sm:$0xff] (!%p212_p2)  ;;  %p239_p3 = scmp.lt.s32.totalorder (!%p212_p2), %s392_s22, 1  ;;  %v433_v2 = vmov (!%p212_p2), 0.0   ;;  %vm434_vm0 = vmmov (!%p212_p2), 0   ;;  %vm260_vm1 = vcmask (!%p212_p2), 130048  }
   0x6   : > { %215 = sbr.rel (%p212_p2) target bundleno = 551 (0x227), region = 44  ;;  %407 = vmatprep.subr.bf16.mxu0 (!%p212_p2), %v433_v2  ;;  %v252_v3 = vpack.c.bf16 (!%p212_p2), %v250_v1, %v249_v0  ;;  %409 = vmatprep.mubr.msk.bf16.mxu0 (!%p212_p2), %vm434_vm0, %v433_v2  ;;  %v399_v6 = vld [vmem:[%s518_s3] ss:$0 sm:$0xff] (!%p212_p2)  ;;  %vm309_vm2 = vcmask (!%p212_p2), 261120  }
   0x7   : > { %v305_v11 = vld [vmem:[%s516_s1] sm:$0xff] (!%p212_p2) }
   0x8   : > { %408 = vmatpush3.bf16.msra.mxu0 (!%p212_p2), %v252_v3  ;;  %v401_v25 = vld [vmem:[%s519_s4] ss:$0 sm:$0xff] (!%p212_p2) }
   0x9   : > { %v402_v27 = vld [vmem:[%s520_s5] ss:$0 sm:$0xff] (!%p212_p2) }
   0xd   : > { %s523_s22 = smov (!%p239_p3, %s392_s22), 1 }
   0xe   : > { %s397_s27 = sshll.u32 %s523_s22, 3 }
   0xf   : > { %s242_s30 = scalar_lea.vmem %s515_s0, %s397_s27  ;;  %s246_s17 = scalar_lea.vmem %s521_s6, %s397_s27 }
  0x10   : > { %v248_v4 = vld [vmem:[%s242_s30] sm:$0xff] }
  0x11   : > { %v251_v5 = vpack.c.bf16 %v248_v4, %v248_v4 }
  0x13   : > { %410 = vmatmul.mubr.msk.bf16.vlgmr.msra.gmra.mrb[0].mxu0 %vm260_vm1, %v251_v5 }
  0xe6   : > { %v298_v7 = vpop.f32.mrb[0].mxu0 }
  0xe7   : > { %v299_v8 = vadd.f32 %v399_v6, %v298_v7  ;;  %v411_v9 = vpop.f32.mrb[1].mxu0 }
  0xe8   : > { %v301_v10 = vpop.f32.mrb[2].mxu0 }
  0xe9   : > { %v304_v12 = vmul.f32 5.656854, %v299_v8  ;;  %v412_v13 = vpop.f32.mrb[3].mxu0 }
  0xeb   : > { %v306_v14 = vadd.f32 %v305_v11, %v304_v12 }
  0xed   : > { %v310_v15 = vsel %vm309_vm2, %v306_v14, 0.0 }
  0xee   : > { %311 = vadd.xlane.f32.xlu0 %v310_v15 }
 0x17b   : > { %v312_v16 = vpop.xlane.xlu0 %311 }
 0x17c   : > { %v314_v17 = vmul.f32 0.03125, %v312_v16 }
 0x17e   : > { %v315_v18 = vsub.f32 %v306_v14, %v314_v17 }
 0x180   : > { %v316_v19 = vmul.f32 %v315_v18, %v315_v18 }
 0x182   : > { %v317_v20 = vsel %vm309_vm2, %v316_v19, 0.0 }
 0x183   : > { %318 = vadd.xlane.f32.xlu0 %v317_v20 }
 0x210   : > { %v319_v21 = vpop.xlane.xlu0 %318 }
 0x211   : > { %v320_v22 = vmul.f32 0.03125, %v319_v21 }
 0x213   : > { %v321_v23 = vadd.f32 1e-05, %v320_v22 }
 0x215   : > { %423 = vrsqrt.f32 %v321_v23 }
 0x21f   : > { %v424_v24 = vpop.eup %423 }
 0x220   : > { %v323_v26 = vmul.f32 %v424_v24, %v315_v18 }
 0x222   : > { %v330_v28 = vmul.f32 %v401_v25, %v323_v26 }
 0x224   : > { %v337_v29 = vadd.f32 %v402_v27, %v330_v28 }
 0x226   : > { %338 = vst.msk [vmem:[%s246_s17] sm:$0xff] %vm309_vm2, %v337_v29 }
 0x227 PF: > { %s16_s21 = sadd.s32 1, %s431_s21  }
 0x228   : > { %p13_p4 = scmp.ge.s32.totalorder %s16_s21, 4  }
 0x22a   :  { %15 = sbr.rel (!%p13_p4) target bundleno = 1 (0x1), region = 74 }

// kernel: forward.7
= control target key start
LH: loop header
LB: loop body
LE: loop exit
PB: predicated region body
PF: predicated region fallthrough
CT: control target
= control target key end

     0   :  { %v483_v0 = vmov 0.0   ;;  %vm484_vm0 = vmmov 0   ;;  %vm121_vm1 = vcmask 1040384   ;;  %vm122_vm2 = vcmask 1041408   ;;  %s712_s3 = inlined_call_operand.vmem [shape: f32[99,64], index: 3, kind: input, shape index: {}]   ;;  %s713_s2 = inlined_call_operand.vmem [shape: f32[2,99], index: 2, kind: input, shape index: {}]   ;;  %s714_s4 = inlined_call_operand.vmem [shape: f32[1,64], index: 4, kind: input, shape index: {}]   ;;  %s715_s1 = inlined_call_operand.vmem [shape: f32[2,8], index: 1, kind: input, shape index: {}]   ;;  %s716_s7 = inlined_call_operand.vmem [shape: f32[96,64], index: 7, kind: input, shape index: {}]   ;;  %s717_s0 = inlined_call_operand.vmem [shape: f32[2,8,32], index: 0, kind: input, shape index: {}]   ;;  %s718_s5 = inlined_call_operand.vmem [shape: f32[1,64], index: 5, kind: input, shape index: {}]   ;;  %s719_s6 = inlined_call_operand.vmem [shape: f32[1,64], index: 6, kind: input, shape index: {}]   ;;  %s720_s9 = inlined_call_operand.vmem [shape: f32[64,1], index: 9, kind: input, shape index: {}]   ;;  %s721_s10 = inlined_call_operand.<no memory space> [shape: f32[1,1], index: 10, kind: input, shape index: {}]   ;;  %s722_s8 = inlined_call_operand.vmem [shape: f32[1,64], index: 8, kind: input, shape index: {}]   ;;  %s723_s11 = inlined_call_operand.vmem [shape: f32[2,1], index: 11, kind: output, shape index: {}]  }
   0x1   :  { %424 = vmatprep.subr.bf16.mxu0 %v483_v0  ;;  %v89_v1 = vld [vmem:[%s712_s3] sm:$0xff]  ;;  %v90_v2 = vld [vmem:[%s712_s3 + $0x8] sm:$0xff]  ;;  %v91_v3 = vld [vmem:[%s712_s3 + $0x10] sm:$0xff]  ;;  %442 = vmatprep.subr.bf16.mxu1 %v483_v0  ;;  %v485_v19 = vmov 65535   ;;  %vm117_vm3 = vcmask 809984   ;;  %vm171_vm4 = vcmask 517120   ;;  %v44_v37 = vlaneseq }
   0x2   :  { %v103_v4 = vpack.c.bf16 %v90_v2, %v89_v1  ;;  %v92_v5 = vld [vmem:[%s712_s3 + $0x18] sm:$0xff]  ;;  %438 = vmatprep.mubr.msk.bf16.mxu0 %vm484_vm0, %v483_v0  ;;  %450 = vmatprep.mubr.msk.bf16.mxu1 %vm484_vm0, %v483_v0  ;;  %v93_v7 = vld [vmem:[%s712_s3 + $0x20] sm:$0xff]  ;;  %v94_v8 = vld [vmem:[%s712_s3 + $0x28] sm:$0xff]  ;;  %v123_v20 = vsel %vm121_vm1, 4294967295, %v485_v19  ;;  %vm60_vm5 = vcmask 58368   ;;  %vm65_vm6 = vcmask 261120  }
   0x3   :  { %v104_v6 = vpack.c.bf16 %v92_v5, %v91_v3  ;;  %v105_v9 = vpack.c.bf16 %v94_v8, %v93_v7  ;;  %v95_v10 = vld [vmem:[%s712_s3 + $0x30] sm:$0xff]  ;;  %v96_v11 = vld [vmem:[%s712_s3 + $0x38] sm:$0xff]  ;;  %v97_v13 = vld [vmem:[%s712_s3 + $0x40] sm:$0xff]  ;;  %v124_v23 = vsel %vm122_vm2, %v123_v20, 0  ;;  %v45_v38 = vshrl.u32 %v44_v37, 7 }
   0x4   :  { %425 = vmatpush3.bf16.msra.mxu0 %v103_v4  ;;  %v106_v12 = vpack.c.bf16 %v96_v11, %v95_v10  ;;  %v98_v14 = vld [vmem:[%s712_s3 + $0x48] sm:$0xff]  ;;  %v99_v16 = vld [vmem:[%s712_s3 + $0x50] sm:$0xff]  ;;  %v100_v17 = vld [vmem:[%s712_s3 + $0x58] sm:$0xff]  ;;  %vm221_vm7 = vcmask 523264   ;;  %vm270_vm8 = vcmask 1041409   ;;  %vm388_vm9 = vcmask 1024  }
   0x5   :  { %426 = vmatprep.subr.bf16.mxu0 %v483_v0  ;;  %v107_v15 = vpack.c.bf16 %v98_v14, %v97_v13  ;;  %v101_v18 = vld [vmem:[%s712_s3 + $0x60] sm:$0x7]  ;;  %v108_v21 = vpack.c.bf16 %v100_v17, %v99_v16  ;;  %v53_v39 = vsub.s32 1, %v45_v38  ;;  %v46_v41 = vsub.s32 0, %v45_v38  ;;  %v209_v49 = vld [vmem:[%s716_s7 + $0x28] sm:$0xff]  ;;  %v210_v51 = vld [vmem:[%s716_s7 + $0x30] sm:$0xff] }
   0x6   :  { %v109_v22 = vpack.c.bf16 %v101_v18, %v101_v18  ;;  %v88_v25 = vld [vmem:[%s713_s2] sm:$0x3]  ;;  %v211_v52 = vld [vmem:[%s716_s7 + $0x38] sm:$0xff]  ;;  %v213_v55 = vld [vmem:[%s716_s7 + $0x48] sm:$0xff] }
   0x7   :  { %v102_v26 = vpack.c.bf16 %v88_v25, %v88_v25  ;;  %v394_v27 = vld [vmem:[%s714_s4] ss:$0 sm:$0xff]  ;;  %v218_v53 = vpack.c.bf16 %v211_v52, %v210_v51  ;;  %v214_v57 = vld [vmem:[%s716_s7 + $0x50] sm:$0xff]  ;;  %v215_v58 = vld [vmem:[%s716_s7 + $0x58] sm:$0xff] }
   0x8   :  { %427 = vmatpush3.bf16.msra.mxu0 %v104_v6  ;;  %v126_v24 = vand.u32 %v124_v23, %v109_v22  ;;  %v43_v35 = vld [vmem:[%s715_s1] sm:$0x3]  ;;  %v220_v59 = vpack.c.bf16 %v215_v58, %v214_v57  ;;  %v201_v61 = vld [vmem:[%s716_s7 + $0x8] sm:$0xff]  ;;  %v202_v63 = vld [vmem:[%s716_s7 + $0x10] sm:$0xff] }
   0x9   :  { %428 = vmatprep.subr.bf16.mxu0 %v483_v0  ;;  %v61_v36 = vsel %vm60_vm5, %v43_v35, 0.0  ;;  %v54_v40 = vrot.slane %v43_v35, %v53_v39  ;;  %v47_v42 = vrot.slane %v43_v35, %v46_v41  ;;  %v208_v48 = vld [vmem:[%s716_s7 + $0x20] sm:$0xff]  ;;  %v203_v1 = vld [vmem:[%s716_s7 + $0x18] sm:$0xff]  ;;  %v42_v14 = vld [vmem:[%s717_s0 + $0x8] sm:$0xff] }
   0xa   :  { %v217_v50 = vpack.c.bf16 %v209_v49, %v208_v48  ;;  %v212_v54 = vld [vmem:[%s716_s7 + $0x40] sm:$0xff]  ;;  %v207_v2 = vpack.c.bf16 %v203_v1, %v202_v63  ;;  %v326_v48 = vld [vmem:[%s720_s9 + $0x8] sm:$0xff]  ;;  %v328_v51 = vld [vmem:[%s720_s9 + $0x18] sm:$0xff] }
   0xb   :  { %v219_v56 = vpack.c.bf16 %v213_v55, %v212_v54  ;;  %v200_v60 = vld [vmem:[%s716_s7] sm:$0xff]  ;;  %v330_v54 = vld [vmem:[%s720_s9 + $0x28] sm:$0xff]  ;;  %v332_v57 = vld [vmem:[%s720_s9 + $0x38] sm:$0xff] }
   0xc   :  { %429 = vmatpush3.bf16.msra.mxu0 %v105_v9  ;;  %443 = vmatpush3.bf16.msra.mxu1 %v217_v50  ;;  %v206_v62 = vpack.c.bf16 %v201_v61, %v200_v60  ;;  %v41_v5 = vld [vmem:[%s717_s0] sm:$0xff]  ;;  %v327_v50 = vld [vmem:[%s720_s9 + $0x10] sm:$0xff] }
   0xd   :  { %430 = vmatprep.subr.bf16.mxu0 %v483_v0  ;;  %444 = vmatprep.subr.bf16.mxu1 %v483_v0  ;;  %v335_v52 = vpack.c.bf16 %v328_v51, %v327_v50  ;;  %v400_v1 = vld [vmem:[%s722_s8] ss:$0 sm:$0xff] }
  0x10   :  { %431 = vmatpush3.bf16.msra.mxu0 %v106_v12  ;;  %445 = vmatpush3.bf16.msra.mxu1 %v218_v53  ;;  %v329_v53 = vld [vmem:[%s720_s9 + $0x20] sm:$0xff] }
  0x11   :  { %432 = vmatprep.subr.bf16.mxu0 %v483_v0  ;;  %446 = vmatprep.subr.bf16.mxu1 %v483_v0  ;;  %v336_v55 = vpack.c.bf16 %v330_v54, %v329_v53 }
  0x14   :  { %433 = vmatpush3.bf16.msra.mxu0 %v107_v15  ;;  %447 = vmatpush3.bf16.msra.mxu1 %v219_v56  ;;  %v331_v56 = vld [vmem:[%s720_s9 + $0x30] sm:$0xff] }
  0x15   :  { %434 = vmatprep.subr.bf16.mxu0 %v483_v0  ;;  %448 = vmatprep.subr.bf16.mxu1 %v483_v0  ;;  %v337_v58 = vpack.c.bf16 %v332_v57, %v331_v56 }
  0x18   :  { %435 = vmatpush3.bf16.msra.mxu0 %v108_v21  ;;  %449 = vmatpush3.bf16.msra.mxu1 %v220_v59  ;;  %v16_v59 = vstv %s721_s10 }
  0x19   :  { %436 = vmatprep.subr.bf16.mxu0 %v483_v0  ;;  %462 = vmatprep.subr.bf16.mxu1 %v483_v0  ;;  %17 = vst [vmem:[#allocation2] sm:$0x1] %v16_v59 }
  0x1c   :  { %437 = vmatpush3.bf16.msra.mxu0 %v126_v24 }
  0x1d   :  { %454 = vmatprep.subr.bf16.mxu0 %v483_v0 }
  0x1f   :  { %439 = vmatmul.mubr.msk.bf16.vlgmr.msra.gmra.mrb[0].mxu0 %vm117_vm3, %v102_v26 }
  0x20   :  { %458 = vmatprep.mubr.msk.bf16.mxu0 %vm484_vm0, %v483_v0  ;;  %455 = vmatpush3.bf16.msra.mxu0 %v206_v62 }
  0x21   :  { %456 = vmatprep.subr.bf16.mxu0 %v483_v0 }
  0x24   :  { %457 = vmatpush3.bf16.msra.mxu0 %v207_v2 }
  0xf2   :  { %v162_v28 = vpop.f32.mrb[0].mxu0 }
  0xf3   :  { %v163_v29 = vadd.f32 %v394_v27, %v162_v28  ;;  %v440_v30 = vpop.f32.mrb[1].mxu0 }
  0xf4   :  { %v165_v31 = vpop.f32.mrb[2].mxu0 }
  0xf5   :  { %v168_v32 = vmax.f32 %v163_v29, 0.0  ;;  %v441_v33 = vpop.f32.mrb[3].mxu0  ;;  %v396_v29 = vld [vmem:[%s718_s5] ss:$0 sm:$0xff] }
  0xf7   :  { %v172_v34 = vsel %vm171_vm4, %v168_v32, 0.0 }
  0xf8   :  { %173 = vadd.xlane.f32.xlu0 %v172_v34 }
  0xfc   :  { %62 = vadd.xlane.f32.xlu0 %v61_v36 }
 0x112   :  { %49 = vbcast.lane.b32.xlu0 %v47_v42, 256 }
 0x185   :  { %v174_v43 = vpop.xlane.xlu0 %173 }
 0x186   :  { %v176_v44 = vmul.f32 0.015625, %v174_v43 }
 0x188   :  { %v610_v45 = vsub.f32 %v168_v32, %v176_v44  ;;  %v397_v32 = vld [vmem:[%s719_s6] ss:$0 sm:$0xff] }
 0x189   :  { %v63_v3 = vpop.xlane.xlu0 %62 }
 0x18a   :  { %v178_v46 = vmul.f32 %v610_v45, %v610_v45  ;;  %v64_v10 = vmax.f32 %v63_v3, 1e-09 }
 0x18c   :  { %v179_v47 = vsel %vm171_vm4, %v178_v46, 0.0  ;;  %477 = vrcp.f32 %v64_v10  ;;  %v81_v17 = vrot.slane %v64_v10, 1 }
 0x18d   :  { %180 = vadd.xlane.f32.xlu1 %v179_v47  ;;  %v50_v4 = vpop.permute.xlu0 %49  ;;  %v325_v47 = vld [vmem:[%s720_s9] sm:$0xff] }
 0x18e   :  { %v58_v6 = vmul.f32 %v50_v4, %v41_v5  ;;  %v334_v49 = vpack.c.bf16 %v326_v48, %v325_v47 }
 0x190   :  { %v66_v7 = vsel %vm65_vm6, %v58_v6, 0.0 }
 0x191   :  { %v67_v8 = vrot.slane %v66_v7, 4 }
 0x193   :  { %v68_v9 = vadd.f32 %v67_v8, %v66_v7 }
 0x195   :  { %v69_v13 = vrot.slane %v68_v9, 2 }
 0x196   :  { %v478_v25 = vpop.eup %477 }
 0x197   :  { %v70_v19 = vadd.f32 %v69_v13, %v68_v9  ;;  %v401_v9 = vld [vmem:[#allocation2] ss:$0 sm:$0xff] }
 0x199   :  { %v71_v22 = vrot.slane %v70_v19, 1 }
 0x19b   :  { %v72_v26 = vadd.f32 %v71_v22, %v70_v19 }
 0x19d   :  { %v85_v33 = vmul.f32 %v478_v25, %v72_v26 }
 0x19e   :  { %56 = vbcast.lane.b32.xlu1 %v54_v40, 256 }
 0x19f   :  { %v204_v39 = vpack.c.bf16 %v85_v33, %v85_v33 }
 0x1a1   :  { %v267_v43 = vunpack.c.l.b16 %v204_v39 }
 0x21a   :  { %v181_v11 = vpop.xlane.xlu1 %180 }
 0x21b   :  { %v182_v12 = vmul.f32 0.015625, %v181_v11 }
 0x21d   :  { %v183_v15 = vadd.f32 1e-05, %v182_v12 }
 0x21e   :  { %v57_v16 = vpop.permute.xlu1 %56 }
 0x21f   :  { %479 = vrsqrt.f32 %v183_v15  ;;  %v59_v18 = vmul.f32 %v57_v16, %v42_v14 }
 0x220   :  { %481 = vrcp.f32 %v81_v17 }
 0x221   :  { %v73_v20 = vsel %vm65_vm6, %v59_v18, 0.0 }
 0x222   :  { %v74_v21 = vrot.slane %v73_v20, 4 }
 0x224   :  { %v75_v23 = vadd.f32 %v74_v21, %v73_v20 }
 0x226   :  { %v76_v24 = vrot.slane %v75_v23, 2 }
 0x228   :  { %v77_v27 = vadd.f32 %v76_v24, %v75_v23 }
 0x229   :  { %v480_v28 = vpop.eup %479 }
 0x22a   :  { %v78_v30 = vrot.slane %v77_v27, 1  ;;  %v185_v31 = vmul.f32 %v480_v28, %v610_v45  ;;  %v482_v36 = vpop.eup %481 }
 0x22c   :  { %v79_v34 = vadd.f32 %v78_v30, %v77_v27  ;;  %v192_v35 = vmul.f32 %v396_v29, %v185_v31 }
 0x22e   :  { %v87_v37 = vmul.f32 %v482_v36, %v79_v34  ;;  %v199_v38 = vadd.f32 %v397_v32, %v192_v35 }
 0x230   :  { %v205_v40 = vpack.c.bf16 %v87_v37, %v87_v37  ;;  %v216_v41 = vpack.c.bf16 %v199_v38, %v199_v38 }
 0x232   :  { %v268_v42 = vunpack.c.l.b16 %v205_v40  ;;  %451 = vmatmul.mubr.msk.bf16.vlgmr.msra.gmra.mrb[0].mxu1 %vm221_vm7, %v216_v41 }
 0x233   :  { %470 = vmatprep.mubr.msk.bf16.mxu1 %vm484_vm0, %v483_v0  ;;  %463 = vmatpush3.bf16.msra.mxu1 %v334_v49 }
 0x234   :  { %v269_v44 = vrot.slane %v268_v42, 7  ;;  %464 = vmatprep.subr.bf16.mxu1 %v483_v0 }
 0x236   :  { %v271_v45 = vsel %vm270_vm8, %v269_v44, %v267_v43 }
 0x237   :  { %v272_v46 = vpack.c.b16 %v271_v45, %v271_v45  ;;  %465 = vmatpush3.bf16.msra.mxu1 %v335_v52 }
 0x238   :  { %466 = vmatprep.subr.bf16.mxu1 %v483_v0 }
 0x239   :  { %459 = vmatmul.mubr.msk.bf16.vlgmr.msra.gmra.mrb[4].mxu0 %vm65_vm6, %v272_v46 }
 0x23b   :  { %467 = vmatpush3.bf16.msra.mxu1 %v336_v55 }
 0x23c   :  { %468 = vmatprep.subr.bf16.mxu1 %v483_v0 }
 0x23f   :  { %469 = vmatpush3.bf16.msra.mxu1 %v337_v58 }
 0x305   :  { %v259_v60 = vpop.f32.mrb[0].mxu1 }
 0x306   :  { %v452_v61 = vpop.f32.mrb[1].mxu1 }
 0x307   :  { %v262_v62 = vpop.f32.mrb[2].mxu1 }
 0x308   :  { %v453_v63 = vpop.f32.mrb[3].mxu1 }
 0x30c   :  { %v310_v0 = vpop.f32.mrb[4].mxu0 }
 0x30d   :  { %v311_v2 = vadd.f32 %v310_v0, %v259_v60  ;;  %v460_v3 = vpop.f32.mrb[5].mxu0 }
 0x30e   :  { %v313_v4 = vpop.f32.mrb[6].mxu0 }
 0x30f   :  { %v323_v5 = vadd.f32 %v400_v1, %v311_v2  ;;  %v461_v6 = vpop.f32.mrb[7].mxu0 }
 0x311   :  { %v324_v7 = vmax.f32 %v323_v5, 0.0 }
 0x313   :  { %v333_v8 = vpack.c.bf16 %v324_v7, %v324_v7 }
 0x315   :  { %471 = vmatmul.mubr.msk.bf16.vlgmr.msra.gmra.mrb[4].mxu1 %vm221_vm7, %v333_v8 }
 0x3e8   :  { %v382_v10 = vpop.f32.mrb[4].mxu1 }
 0x3e9   :  { %v383_v11 = vadd.f32 %v401_v9, %v382_v10  ;;  %v472_v12 = vpop.f32.mrb[5].mxu1 }
 0x3ea   :  { %v385_v13 = vpop.f32.mrb[6].mxu1 }
 0x3eb   :  { %389 = vst.msk [vmem:[%s723_s11] sm:$0x3] %vm388_vm9, %v383_v11  ;;  %v473_v14 = vpop.f32.mrb[7].mxu1 }

// kernel: forward.5
= control target key start
LH: loop header
LB: loop body
LE: loop exit
PB: predicated region body
PF: predicated region fallthrough
CT: control target
= control target key end

     0   :  { %s1770_s29 = smov 0   ;;  %s2027_s0 = inlined_call_operand.vmem [shape: f32[2,8,32], index: 0, kind: input, shape index: {}]   ;;  %s2028_s1 = inlined_call_operand.vmem [shape: f32[2,1,8], index: 1, kind: input, shape index: {}]   ;;  %s2029_s2 = inlined_call_operand.vmem [shape: f32[32,96], index: 2, kind: input, shape index: {}]   ;;  %s2030_s3 = inlined_call_operand.vmem [shape: f32[1,96], index: 3, kind: input, shape index: {}]   ;;  %s2031_s4 = inlined_call_operand.vmem [shape: f32[32,32], index: 4, kind: input, shape index: {}]   ;;  %s2032_s5 = inlined_call_operand.vmem [shape: f32[1,32], index: 5, kind: input, shape index: {}]   ;;  %s2033_s6 = inlined_call_operand.vmem [shape: f32[1,32], index: 6, kind: input, shape index: {}]   ;;  %s2034_s7 = inlined_call_operand.vmem [shape: f32[1,32], index: 7, kind: input, shape index: {}]   ;;  %s2035_s8 = inlined_call_operand.vmem [shape: f32[32,128], index: 8, kind: input, shape index: {}]   ;;  %s2036_s9 = inlined_call_operand.vmem [shape: f32[1,128], index: 9, kind: input, shape index: {}]   ;;  %s2037_s10 = inlined_call_operand.vmem [shape: f32[128,32], index: 10, kind: input, shape index: {}]   ;;  %s2038_s11 = inlined_call_operand.vmem [shape: f32[1,32], index: 11, kind: input, shape index: {}]   ;;  %s2039_s12 = inlined_call_operand.vmem [shape: f32[1,32], index: 12, kind: input, shape index: {}]   ;;  %s2040_s13 = inlined_call_operand.vmem [shape: f32[1,32], index: 13, kind: input, shape index: {}]   ;;  %s2041_s14 = inlined_call_operand.vmem [shape: f32[2,8,32], index: 14, kind: output, shape index: {}]  }
   0x1 LB: > { %s1454_s30 = sadd.s32 4294967295, %s1680_s29   ;;  %p1458_p0 = scmp.ge.s32.totalorder %s1680_s29, 1  ;;  %s1680_s29 = sphi %s1770_s29, %s24_s29  }
   0x2   : > { %p419_p1 = scmp.lt.s32.totalorder %s1680_s29, 3 }
   0x4   : > { %p420_p2 = pnand %p1458_p0, %p419_p1 }
   0x5   : > { %v480_v0 = vld [vmem:[%s2029_s2] sm:$0xff] (!%p420_p2)  ;;  %v481_v1 = vld [vmem:[%s2029_s2 + $0x8] sm:$0xff] (!%p420_p2)  ;;  %v482_v2 = vld [vmem:[%s2029_s2 + $0x10] sm:$0xff] (!%p420_p2)  ;;  %p466_p3 = scmp.lt.s32.totalorder (!%p420_p2), %s1454_s30, 1  ;;  %v1682_v3 = vmov (!%p420_p2), 0.0   ;;  %vm1683_vm0 = vmmov (!%p420_p2), 0  }
   0x6   : > { %423 = sbr.rel (%p420_p2) target bundleno = 4219 (0x107b), region = 76  ;;  %1525 = vmatprep.subr.bf16.mxu1 (!%p420_p2), %v1682_v3  ;;  %v485_v4 = vpack.c.bf16 (!%p420_p2), %v481_v1, %v480_v0  ;;  %v483_v5 = vld [vmem:[%s2029_s2 + $0x18] sm:$0xff] (!%p420_p2)  ;;  %1529 = vmatprep.mubr.msk.bf16.mxu1 (!%p420_p2), %vm1683_vm0, %v1682_v3  ;;  %vm494_vm1 = vcmask (!%p420_p2), 261120   ;;  %v1461_v9 = vld [vmem:[%s2030_s3] ss:$0 sm:$0xff] (!%p420_p2)  ;;  %s1684_s15 = smov (!%p420_p2), 64  }
   0x7   : > { %1551 = vmatprep.subr.bf16.mxu0 (!%p420_p2), %v1682_v3  ;;  %1553 = vmatprep.mubr.msk.bf16.mxu0 (!%p420_p2), %vm1683_vm0, %v1682_v3  ;;  %v486_v6 = vpack.c.bf16 (!%p420_p2), %v483_v5, %v482_v2  ;;  %s1685_s16 = smov (!%p420_p2), 96   ;;  %vm546_vm2 = vcmask (!%p420_p2), 64512   ;;  %vm618_vm3 = vcmask (!%p420_p2), 1043456   ;;  %s1686_s20 = smov (!%p420_p2), 88   ;;  %v539_v56 = vld [vmem:[%s2031_s4 + $0x8] sm:$0xff] (!%p420_p2)  ;;  %v538_v62 = vld [vmem:[%s2031_s4] sm:$0xff] (!%p420_p2) }
   0x8   : > { %1526 = vmatpush3.bf16.msra.mxu1 (!%p420_p2), %v485_v4  ;;  %s1687_s21 = smov (!%p420_p2), 120   ;;  %s1688_s22 = smov (!%p420_p2), 56   ;;  %v777_v57 = vpack.c.bf16 (!%p420_p2), %v539_v56, %v539_v56  ;;  %v663_v63 = vpack.c.bf16 (!%p420_p2), %v538_v62, %v538_v62 }
   0x9   : > { %1527 = vmatprep.subr.bf16.mxu1 (!%p420_p2), %v1682_v3  ;;  %s1689_s24 = smov (!%p420_p2), 80   ;;  %s1690_s25 = smov (!%p420_p2), 112  }
   0xa   : > { %v782_v58 = vsel (!%p420_p2), %vm618_vm3, %v777_v57, 0  ;;  %v828_v4 = vsel (!%p420_p2), %vm618_vm3, %v663_v63, 0  ;;  %s1692_s17 = smov (!%p420_p2), 72   ;;  %s1693_s18 = smov (!%p420_p2), 104  }
   0xc   : > { %1528 = vmatpush3.bf16.msra.mxu1 (!%p420_p2), %v486_v6 }
   0xd   : > { %s2043_s30 = smov (!%p466_p3, %s1454_s30), 1  ;;  %1533 = vmatprep.subr.bf16.mxu1 %v1682_v3 }
   0xe   : > { %s1459_s23 = sshll.u32 %s2043_s30, 3  ;;  %s472_s19 = scalar_lea.vmem %s2028_s1, %s2043_s30 }
   0xf   : > { %s469_s26 = scalar_lea.vmem %s2027_s0, %s1459_s23  ;;  %v1832_v21 = vld [vmem:[%s472_s19] ss:$0 sm:$0xff] }
  0x10   : > { %v1805_v7 = vld [vmem:[%s469_s26] sm:$0xff] }
  0x11   : > { %v484_v8 = vpack.c.bf16 %v1805_v7, %v1805_v7 }
  0x13   : > { %1530 = vmatmul.mubr.msk.bf16.vlgmr.msra.gmra.mrb[0].mxu1 %vm494_vm1, %v484_v8 }
  0x14   : > { %1535 = vmatprep.mubr.msk.bf16.mxu1 %vm1683_vm0, %v1682_v3 }
  0xe6   : > { %v532_v10 = vpop.f32.mrb[0].mxu1 }
  0xe7   : > { %v533_v11 = vadd.f32 %v1461_v9, %v532_v10  ;;  %v1531_v12 = vpop.f32.mrb[1].mxu1 }
  0xe8   : > { %v535_v13 = vpop.f32.mrb[2].mxu1 }
  0xe9   : > { %v1816_v14 = vpack.c.bf16 %v533_v11, %v533_v11  ;;  %v1532_v15 = vpop.f32.mrb[3].mxu1 }
  0xeb   : > { %613 = vrot.lane.b32.xlu1 %v1816_v14, %s1684_s15  ;;  %544 = vrot.lane.b32.xlu0 %v1816_v14, %s1685_s16  ;;  %s1691_s16 = smov 48   ;;  %s476_s15 = scalar_lea.vmem %s2041_s14, %s1459_s23 }
 0x15d   : > { %v545_v16 = vpop.permute.xlu0 %544  ;;  %v614_v18 = vpop.permute.xlu1 %613 }
 0x15e   : > { %v551_v17 = vsel %vm546_vm2, %v545_v16, 0  ;;  %v620_v19 = vsel %vm618_vm3, %v614_v18, 0 }
 0x15f   : > { %1534 = vmatpush3.bf16.xpose.msra.mxu1 %v551_v17 }
 0x160   : > { %1539 = vmatprep.subr.bf16.mxu1 %v1682_v3 }
 0x166   : > { %1536 = vmatmul.mubr.msk.bf16.vlgmr.msra.gmra.mrb[4].mxu1 %vm546_vm2, %v1816_v14 }
 0x167   : > { %1540 = vmatpush3.bf16.msra.mxu1 %v620_v19  ;;  %1541 = vmatprep.mubr.msk.bf16.mxu1 %vm1683_vm0, %v1682_v3 }
 0x168   : > { %1545 = vmatprep.subr.bf16.mxu1 %v1682_v3 }
 0x239   : > { %v587_v20 = vpop.f32.mrb[4].mxu1 }
 0x23a   : > { %v593_v22 = vmul.f32 0.35355338, %v587_v20  ;;  %v1537_v23 = vpop.f32.mrb[5].mxu1 }
 0x23b   : > { %v590_v24 = vpop.f32.mrb[6].mxu1 }
 0x23c   : > { %v1538_v25 = vpop.f32.mrb[7].mxu1  ;;  %v600_v26 = vadd.f32 %v1832_v21, %v593_v22 }
 0x23e   : > { %v601_v27 = vsel %vm546_vm2, %v600_v26, -inf }
 0x23f   : > { %602 = vmax.xlane.f32.xlu0 %v601_v27 }
 0x2cc   : > { %v603_v28 = vpop.xlane.xlu0 %602 }
 0x2cd   : > { %v604_v29 = vsub.f32 %v600_v26, %v603_v28 }
 0x2cf   : > { %v605_v30 = vmul.f32 1.442695, %v604_v29 }
 0x2d1   : > { %1654 = vpow2.f32 %v605_v30 }
 0x2db   : > { %v1655_v31 = vpop.eup %1654 }
 0x2dc   : > { %v607_v32 = vsel %vm546_vm2, %v1655_v31, 0.0 }
 0x2dd   : > { %608 = vadd.xlane.f32.xlu1 %v607_v32 }
 0x2ee   : > { %666 = vrot.lane.b32.xlu1 %v1816_v14, %s1686_s20 }
 0x2f2   : > { %664 = vrot.lane.b32.xlu1 %v1816_v14, %s1687_s21  ;;  %s1694_s21 = smov 40  }
 0x36a   : > { %v609_v33 = vpop.xlane.xlu1 %608 }
 0x36b   : > { %1656 = vrcp.f32 %v609_v33 }
 0x36e   : > { %v667_v36 = vpop.permute.xlu1 %666 }
 0x36f   : > { %v672_v38 = vsel %vm546_vm2, %v667_v36, 0 }
 0x372   : > { %v665_v39 = vpop.permute.xlu1 %664 }
 0x375   : > { %v1657_v34 = vpop.eup %1656 }
 0x376   : > { %v611_v35 = vmul.f32 %v1657_v34, %v1655_v31 }
 0x378   : > { %v612_v37 = vpack.c.bf16 %v611_v35, %v611_v35 }
 0x37a   : > { %1542 = vmatmul.mubr.msk.bf16.vlgmr.msra.gmra.mrb[8].mxu1 %vm546_vm2, %v612_v37 }
 0x37b   : > { %1546 = vmatpush3.bf16.xpose.msra.mxu1 %v672_v38  ;;  %1547 = vmatprep.mubr.msk.bf16.mxu1 %vm1683_vm0, %v1682_v3 }
 0x37c   : > { %1557 = vmatprep.subr.bf16.mxu1 %v1682_v3 }
 0x382   : > { %1548 = vmatmul.mubr.msk.bf16.vlgmr.msra.gmra.mrb[12].mxu1 %vm546_vm2, %v665_v39 }
 0x383   : > { %1559 = vmatprep.mubr.msk.bf16.mxu1 %vm1683_vm0, %v1682_v3  ;;  %1558 = vmatpush3.bf16.msra.mxu1 %v782_v58 }
 0x384   : > { %1569 = vmatprep.subr.bf16.mxu1 %v1682_v3 }
 0x44d   : > { %v656_v40 = vpop.f32.mrb[8].mxu1 }
 0x44e   : > { %v1543_v41 = vpop.f32.mrb[9].mxu1  ;;  %v662_v5 = vpack.c.bf16 %v656_v40, %v656_v40 }
 0x44f   : > { %v659_v42 = vpop.f32.mrb[10].mxu1 }
 0x450   : > { %v1544_v43 = vpop.f32.mrb[11].mxu1 }
 0x455   : > { %v708_v44 = vpop.f32.mrb[12].mxu1 }
 0x456   : > { %v714_v45 = vmul.f32 0.35355338, %v708_v44  ;;  %v1549_v46 = vpop.f32.mrb[13].mxu1 }
 0x457   : > { %v711_v47 = vpop.f32.mrb[14].mxu1 }
 0x458   : > { %v1550_v48 = vpop.f32.mrb[15].mxu1  ;;  %v715_v49 = vadd.f32 %v1832_v21, %v714_v45  ;;  %v540_v47 = vld [vmem:[%s2031_s4 + $0x10] sm:$0xff] }
 0x459   : > { %v983_v48 = vpack.c.bf16 %v540_v47, %v540_v47  ;;  %v1292_v47 = vld [vmem:[%s2037_s10 + $0x18] sm:$0xff] }
 0x45a   : > { %v716_v50 = vsel %vm546_vm2, %v715_v49, -inf }
 0x45b   : > { %717 = vmax.xlane.f32.xlu1 %v716_v50 }
 0x4e8   : > { %v718_v51 = vpop.xlane.xlu1 %717 }
 0x4e9   : > { %v719_v52 = vsub.f32 %v715_v49, %v718_v51  ;;  %v988_v49 = vsel %vm618_vm3, %v983_v48, 0 }
 0x4eb   : > { %v720_v53 = vmul.f32 1.442695, %v719_v52 }
 0x4ed   : > { %1658 = vpow2.f32 %v720_v53 }
 0x4f7   : > { %v1659_v54 = vpop.eup %1658 }
 0x4f8   : > { %v722_v55 = vsel %vm546_vm2, %v1659_v54, 0.0 }
 0x4f9   : > { %723 = vadd.xlane.f32.xlu0 %v722_v55 }
 0x50f   : > { %728 = vrot.lane.b32.xlu0 %v1816_v14, %s1688_s22 }
 0x513   : > { %872 = vrot.lane.b32.xlu0 %v1816_v14, %s1689_s24 }
 0x517   : > { %870 = vrot.lane.b32.xlu0 %v1816_v14, %s1690_s25 }
 0x586   : > { %v724_v59 = vpop.xlane.xlu0 %723 }
 0x587   : > { %1660 = vrcp.f32 %v724_v59 }
 0x58a   : > { %v729_v60 = vpop.permute.xlu0 %728 }
 0x58b   : > { %v734_v61 = vsel %vm618_vm3, %v729_v60, 0 }
 0x58c   : > { %1552 = vmatpush3.bf16.msra.mxu0 %v734_v61 }
 0x58d   : > { %1563 = vmatprep.subr.bf16.mxu0 %v1682_v3 }
 0x58e   : > { %v873_v6 = vpop.permute.xlu0 %872 }
 0x58f   : > { %v878_v12 = vsel %vm546_vm2, %v873_v6, 0 }
 0x591   : > { %v1661_v0 = vpop.eup %1660 }
 0x592   : > { %v726_v1 = vmul.f32 %v1661_v0, %v1659_v54  ;;  %v871_v17 = vpop.permute.xlu0 %870 }
 0x594   : > { %v727_v2 = vpack.c.bf16 %v726_v1, %v726_v1 }
 0x596   : > { %1554 = vmatmul.mubr.msk.bf16.vlgmr.msra.gmra.mrb[0].mxu0 %vm546_vm2, %v727_v2 }
 0x597   : > { %1564 = vmatpush3.bf16.msra.mxu0 %v828_v4  ;;  %1565 = vmatprep.mubr.msk.bf16.mxu0 %vm1683_vm0, %v1682_v3  ;;  %v541_v4 = vld [vmem:[%s2031_s4 + $0x18] sm:$0xff] }
 0x598   : > { %1575 = vmatprep.subr.bf16.mxu0 %v1682_v3 }
 0x59e   : > { %1566 = vmatmul.mubr.msk.bf16.vlgmr.msra.gmra.mrb[4].mxu0 %vm546_vm2, %v662_v5  ;;  %v1144_v5 = vpack.c.bf16 %v541_v4, %v541_v4  ;;  %v1478_v4 = vld [vmem:[%s2034_s7] ss:$0 sm:$0xff] }
 0x59f   : > { %1577 = vmatprep.mubr.msk.bf16.mxu0 %vm1683_vm0, %v1682_v3 }
 0x669   : > { %v770_v8 = vpop.f32.mrb[0].mxu0 }
 0x66a   : > { %v776_v9 = vpack.c.bf16 %v770_v8, %v770_v8  ;;  %v1555_v10 = vpop.f32.mrb[1].mxu0 }
 0x66b   : > { %v773_v11 = vpop.f32.mrb[2].mxu0 }
 0x66c   : > { %v1556_v13 = vpop.f32.mrb[3].mxu0  ;;  %1560 = vmatmul.mubr.msk.bf16.vlgmr.msra.gmra.mrb[16].mxu1 %vm546_vm2, %v776_v9 }
 0x66d   : > { %1570 = vmatpush3.bf16.xpose.msra.mxu1 %v878_v12  ;;  %1571 = vmatprep.mubr.msk.bf16.mxu1 %vm1683_vm0, %v1682_v3 }
 0x66e   : > { %1581 = vmatprep.subr.bf16.mxu1 %v1682_v3 }
 0x671   : > { %v864_v15 = vpop.f32.mrb[4].mxu0 }
 0x672   : > { %v1567_v16 = vpop.f32.mrb[5].mxu0 }
 0x673   : > { %v867_v18 = vpop.f32.mrb[6].mxu0 }
 0x674   : > { %v1568_v19 = vpop.f32.mrb[7].mxu0  ;;  %1572 = vmatmul.mubr.msk.bf16.vlgmr.msra.gmra.mrb[20].mxu1 %vm546_vm2, %v871_v17 }
 0x675   : > { %1583 = vmatprep.mubr.msk.bf16.mxu1 %vm1683_vm0, %v1682_v3  ;;  %1582 = vmatpush3.bf16.msra.mxu1 %v988_v49  ;;  %v1293_v49 = vld [vmem:[%s2037_s10 + $0x20] sm:$0xff] }
 0x676   : > { %1593 = vmatprep.subr.bf16.mxu1 %v1682_v3 }
 0x73f   : > { %v818_v20 = vpop.f32.mrb[16].mxu1 }
 0x740   : > { %v1879_v22 = vadd.f32 %v864_v15, %v818_v20  ;;  %v1561_v23 = vpop.f32.mrb[17].mxu1 }
 0x741   : > { %v821_v24 = vpop.f32.mrb[18].mxu1 }
 0x742   : > { %v1562_v25 = vpop.f32.mrb[19].mxu1 }
 0x743   : > { %v1476_v25 = vld [vmem:[%s2032_s5] ss:$0 sm:$0xff] }
 0x747   : > { %v914_v26 = vpop.f32.mrb[20].mxu1 }
 0x748   : > { %v920_v27 = vmul.f32 0.35355338, %v914_v26  ;;  %v1573_v28 = vpop.f32.mrb[21].mxu1 }
 0x749   : > { %v917_v29 = vpop.f32.mrb[22].mxu1 }
 0x74a   : > { %v1574_v30 = vpop.f32.mrb[23].mxu1  ;;  %v921_v31 = vadd.f32 %v1832_v21, %v920_v27 }
 0x74c   : > { %v922_v32 = vsel %vm546_vm2, %v921_v31, -inf }
 0x74d   : > { %923 = vmax.xlane.f32.xlu1 %v922_v32 }
 0x75e   : > { %934 = vrot.lane.b32.xlu1 %v1816_v14, %s1691_s16 }
 0x762   : > { %1033 = vrot.lane.b32.xlu1 %v1816_v14, %s1692_s17 }
 0x766   : > { %1031 = vrot.lane.b32.xlu1 %v1816_v14, %s1693_s18 }
 0x7da   : > { %v924_v33 = vpop.xlane.xlu1 %923 }
 0x7db   : > { %v925_v34 = vsub.f32 %v921_v31, %v924_v33 }
 0x7dd   : > { %v926_v35 = vmul.f32 1.442695, %v925_v34 }
 0x7de   : > { %v935_v36 = vpop.permute.xlu1 %934 }
 0x7df   : > { %1662 = vpow2.f32 %v926_v35  ;;  %v940_v37 = vsel %vm618_vm3, %v935_v36, 0 }
 0x7e0   : > { %1576 = vmatpush3.bf16.msra.mxu0 %v940_v37 }
 0x7e1   : > { %1587 = vmatprep.subr.bf16.mxu0 %v1682_v3 }
 0x7e2   : > { %v1034_v43 = vpop.permute.xlu1 %1033 }
 0x7e3   : > { %v1039_v45 = vsel %vm546_vm2, %v1034_v43, 0  ;;  %v1289_v43 = vld [vmem:[%s2037_s10] sm:$0xff] }
 0x7e6   : > { %v1032_v46 = vpop.permute.xlu1 %1031 }
 0x7e9   : > { %v1663_v38 = vpop.eup %1662 }
 0x7ea   : > { %v928_v39 = vsel %vm546_vm2, %v1663_v38, 0.0 }
 0x7eb   : > { %929 = vadd.xlane.f32.xlu0 %v928_v39  ;;  %v1232_v39 = vld [vmem:[%s2035_s8 + $0x8] sm:$0xff] }
 0x878   : > { %v930_v40 = vpop.xlane.xlu0 %929 }
 0x879   : > { %1664 = vrcp.f32 %v930_v40 }
 0x883   : > { %v1665_v41 = vpop.eup %1664 }
 0x884   : > { %v932_v42 = vmul.f32 %v1665_v41, %v1663_v38  ;;  %v1231_v38 = vld [vmem:[%s2035_s8] sm:$0xff]  ;;  %v1234_v41 = vld [vmem:[%s2035_s8 + $0x18] sm:$0xff] }
 0x885   : > { %v1236_v40 = vpack.c.bf16 %v1232_v39, %v1231_v38  ;;  %v1482_v39 = vld [vmem:[%s2039_s12] ss:$0 sm:$0xff] }
 0x886   : > { %v933_v44 = vpack.c.bf16 %v932_v42, %v932_v42 }
 0x888   : > { %1578 = vmatmul.mubr.msk.bf16.vlgmr.msra.gmra.mrb[8].mxu0 %vm546_vm2, %v933_v44  ;;  %v1290_v44 = vld [vmem:[%s2037_s10 + $0x8] sm:$0xff] }
 0x889   : > { %1588 = vmatpush3.bf16.xpose.msra.mxu0 %v1039_v45  ;;  %1589 = vmatprep.mubr.msk.bf16.mxu0 %vm1683_vm0, %v1682_v3  ;;  %v1291_v45 = vld [vmem:[%s2037_s10 + $0x10] sm:$0xff] }
 0x88a   : > { %1599 = vmatprep.subr.bf16.mxu0 %v1682_v3  ;;  %v1307_v48 = vpack.c.bf16 %v1292_v47, %v1291_v45 }
 0x890   : > { %1590 = vmatmul.mubr.msk.bf16.vlgmr.msra.gmra.mrb[12].mxu0 %vm546_vm2, %v1032_v46  ;;  %v1306_v46 = vpack.c.bf16 %v1290_v44, %v1289_v43 }
 0x891   : > { %1601 = vmatprep.mubr.msk.bf16.mxu0 %vm1683_vm0, %v1682_v3 }
 0x95b   : > { %v976_v50 = vpop.f32.mrb[8].mxu0 }
 0x95c   : > { %v982_v51 = vpack.c.bf16 %v976_v50, %v976_v50  ;;  %v1579_v52 = vpop.f32.mrb[9].mxu0  ;;  %v1294_v50 = vld [vmem:[%s2037_s10 + $0x28] sm:$0xff] }
 0x95d   : > { %v979_v53 = vpop.f32.mrb[10].mxu0  ;;  %v1295_v52 = vld [vmem:[%s2037_s10 + $0x30] sm:$0xff] }
 0x95e   : > { %v1580_v54 = vpop.f32.mrb[11].mxu0  ;;  %1584 = vmatmul.mubr.msk.bf16.vlgmr.msra.gmra.mrb[24].mxu1 %vm546_vm2, %v982_v51  ;;  %v1308_v51 = vpack.c.bf16 %v1294_v50, %v1293_v49  ;;  %v1296_v53 = vld [vmem:[%s2037_s10 + $0x38] sm:$0xff] }
 0x95f   : > { %1595 = vmatprep.mubr.msk.bf16.mxu1 %vm1683_vm0, %v1682_v3  ;;  %v1309_v54 = vpack.c.bf16 %v1296_v53, %v1295_v52 }
 0x963   : > { %v1075_v55 = vpop.f32.mrb[12].mxu0 }
 0x964   : > { %v1081_v56 = vmul.f32 0.35355338, %v1075_v55  ;;  %v1591_v57 = vpop.f32.mrb[13].mxu0  ;;  %v1297_v55 = vld [vmem:[%s2037_s10 + $0x40] sm:$0xff] }
 0x965   : > { %v1078_v58 = vpop.f32.mrb[14].mxu0 }
 0x966   : > { %v1592_v59 = vpop.f32.mrb[15].mxu0  ;;  %v1082_v60 = vadd.f32 %v1832_v21, %v1081_v56  ;;  %v1149_v21 = vsel %vm618_vm3, %v1144_v5, 0  ;;  %v1298_v56 = vld [vmem:[%s2037_s10 + $0x48] sm:$0xff]  ;;  %v1299_v58 = vld [vmem:[%s2037_s10 + $0x50] sm:$0xff] }
 0x967   : > { %1600 = vmatpush3.bf16.msra.mxu0 %v1149_v21  ;;  %v1310_v57 = vpack.c.bf16 %v1298_v56, %v1297_v55  ;;  %v1300_v59 = vld [vmem:[%s2037_s10 + $0x58] sm:$0xff] }
 0x968   : > { %v1083_v61 = vsel %vm546_vm2, %v1082_v60, -inf  ;;  %1613 = vmatprep.subr.bf16.mxu0 %v1682_v3 }
 0x969   : > { %1084 = vmax.xlane.f32.xlu1 %v1083_v61 }
 0x9f6   : > { %v1085_v62 = vpop.xlane.xlu1 %1084 }
 0x9f7   : > { %v1086_v63 = vsub.f32 %v1082_v60, %v1085_v62  ;;  %v1311_v60 = vpack.c.bf16 %v1300_v59, %v1299_v58 }
 0x9f9   : > { %v1087_v0 = vmul.f32 1.442695, %v1086_v63 }
 0x9fb   : > { %1666 = vpow2.f32 %v1087_v0 }
 0xa05   : > { %v1667_v1 = vpop.eup %1666 }
 0xa06   : > { %v1089_v2 = vsel %vm546_vm2, %v1667_v1, 0.0 }
 0xa07   : > { %1090 = vadd.xlane.f32.xlu0 %v1089_v2 }
 0xa1d   : > { %1095 = vrot.lane.b32.xlu0 %v1816_v14, %s1694_s21 }
 0xa31   : > { %v1024_v6 = vpop.f32.mrb[24].mxu1 }
 0xa32   : > { %v1030_v8 = vadd.f32 %v1024_v6, %v1879_v22  ;;  %v1585_v9 = vpop.f32.mrb[25].mxu1 }
 0xa33   : > { %v1027_v10 = vpop.f32.mrb[26].mxu1  ;;  %v1302_v9 = vld [vmem:[%s2037_s10 + $0x68] sm:$0xff] }
 0xa34   : > { %v1586_v11 = vpop.f32.mrb[27].mxu1 }
 0xa35   : > { %v1303_v11 = vld [vmem:[%s2037_s10 + $0x70] sm:$0xff] }
 0xa94   : > { %v1091_v12 = vpop.xlane.xlu0 %1090 }
 0xa95   : > { %1668 = vrcp.f32 %v1091_v12  ;;  %v1304_v12 = vld [vmem:[%s2037_s10 + $0x78] sm:$0xff] }
 0xa98   : > { %v1096_v13 = vpop.permute.xlu0 %1095 }
 0xa99   : > { %v1101_v14 = vsel %vm618_vm3, %v1096_v13, 0  ;;  %v1313_v13 = vpack.c.bf16 %v1304_v12, %v1303_v11 }
 0xa9a   : > { %1594 = vmatpush3.bf16.msra.mxu1 %v1101_v14  ;;  %v1479_v14 = vld [vmem:[%s2036_s9] ss:$0 sm:$0xff] }
 0xa9b   : > { %1605 = vmatprep.subr.bf16.mxu1 %v1682_v3 }
 0xa9f   : > { %v1669_v15 = vpop.eup %1668 }
 0xaa0   : > { %v1093_v16 = vmul.f32 %v1669_v15, %v1667_v1  ;;  %v1477_v1 = vld [vmem:[%s2033_s6] ss:$0 sm:$0xff] }
 0xaa2   : > { %v1094_v17 = vpack.c.bf16 %v1093_v16, %v1093_v16 }
 0xaa4   : > { %1596 = vmatmul.mubr.msk.bf16.vlgmr.msra.gmra.mrb[28].mxu1 %vm546_vm2, %v1094_v17 }
 0xaa5   : > { %1609 = vmatprep.mubr.msk.bf16.mxu1 %vm1683_vm0, %v1682_v3  ;;  %1606 = vmatpush3.bf16.msra.mxu1 %v1236_v40 }
 0xaa6   : > { %1607 = vmatprep.subr.bf16.mxu1 %v1682_v3 }
 0xb77   : > { %v1137_v18 = vpop.f32.mrb[28].mxu1 }
 0xb78   : > { %v1143_v19 = vpack.c.bf16 %v1137_v18, %v1137_v18  ;;  %v1597_v20 = vpop.f32.mrb[29].mxu1 }
 0xb79   : > { %v1140_v22 = vpop.f32.mrb[30].mxu1 }
 0xb7a   : > { %v1598_v23 = vpop.f32.mrb[31].mxu1  ;;  %1602 = vmatmul.mubr.msk.bf16.vlgmr.msra.gmra.mrb[16].mxu0 %vm546_vm2, %v1143_v19  ;;  %v1481_v22 = vld [vmem:[%s2038_s11] ss:$0 sm:$0xff] }
 0xb7b   : > { %1629 = vmatprep.mubr.msk.bf16.mxu0 %vm1683_vm0, %v1682_v3  ;;  %1614 = vmatpush3.bf16.msra.mxu0 %v1306_v46 }
 0xb7c   : > { %1615 = vmatprep.subr.bf16.mxu0 %v1682_v3 }
 0xb7f   : > { %1616 = vmatpush3.bf16.msra.mxu0 %v1307_v48 }
 0xb80   : > { %1617 = vmatprep.subr.bf16.mxu0 %v1682_v3 }
 0xb83   : > { %1618 = vmatpush3.bf16.msra.mxu0 %v1308_v51 }
 0xb84   : > { %1619 = vmatprep.subr.bf16.mxu0 %v1682_v3 }
 0xb87   : > { %1620 = vmatpush3.bf16.msra.mxu0 %v1309_v54 }
 0xb88   : > { %1621 = vmatprep.subr.bf16.mxu0 %v1682_v3 }
 0xb8b   : > { %1622 = vmatpush3.bf16.msra.mxu0 %v1310_v57 }
 0xb8c   : > { %1623 = vmatprep.subr.bf16.mxu0 %v1682_v3 }
 0xb8f   : > { %1624 = vmatpush3.bf16.msra.mxu0 %v1311_v60 }
 0xb90   : > { %1625 = vmatprep.subr.bf16.mxu0 %v1682_v3 }
 0xc4d   : > { %v1185_v24 = vpop.f32.mrb[16].mxu0 }
 0xc4e   : > { %v1191_v26 = vadd.f32 %v1185_v24, %v1030_v8  ;;  %v1603_v27 = vpop.f32.mrb[17].mxu0  ;;  %v1301_v8 = vld [vmem:[%s2037_s10 + $0x60] sm:$0xff] }
 0xc4f   : > { %v1188_v28 = vpop.f32.mrb[18].mxu0  ;;  %v1312_v10 = vpack.c.bf16 %v1302_v9, %v1301_v8 }
 0xc50   : > { %v1199_v29 = vadd.f32 %v1476_v25, %v1191_v26  ;;  %v1604_v30 = vpop.f32.mrb[19].mxu0 }
 0xc51   : > { %1626 = vmatpush3.bf16.msra.mxu0 %v1312_v10 }
 0xc52   : > { %v1200_v31 = vadd.f32 %v1199_v29, %v1805_v7  ;;  %v1233_v7 = vld [vmem:[%s2035_s8 + $0x10] sm:$0xff]  ;;  %1627 = vmatprep.subr.bf16.mxu0 %v1682_v3 }
 0xc53   : > { %v1237_v42 = vpack.c.bf16 %v1234_v41, %v1233_v7  ;;  %v1483_v7 = vld [vmem:[%s2040_s13] ss:$0 sm:$0xff] }
 0xc54   : > { %v1203_v32 = vsel %vm494_vm1, %v1200_v31, 0.0 }
 0xc55   : > { %1204 = vadd.xlane.f32.xlu0 %v1203_v32  ;;  %1608 = vmatpush3.bf16.msra.mxu1 %v1237_v42 }
 0xc56   : > { %1628 = vmatpush3.bf16.msra.mxu0 %v1313_v13 }
 0xce2   : > { %v1205_v33 = vpop.xlane.xlu0 %1204 }
 0xce3   : > { %v1207_v34 = vmul.f32 0.03125, %v1205_v33 }
 0xce5   : > { %v1208_v35 = vsub.f32 %v1200_v31, %v1207_v34 }
 0xce7   : > { %v1209_v36 = vmul.f32 %v1208_v35, %v1208_v35 }
 0xce9   : > { %v1210_v37 = vsel %vm494_vm1, %v1209_v36, 0.0 }
 0xcea   : > { %1211 = vadd.xlane.f32.xlu1 %v1210_v37 }
 0xd77   : > { %v1212_v61 = vpop.xlane.xlu1 %1211 }
 0xd78   : > { %v1213_v62 = vmul.f32 0.03125, %v1212_v61 }
 0xd7a   : > { %v1214_v63 = vadd.f32 1e-05, %v1213_v62 }
 0xd7c   : > { %1670 = vrsqrt.f32 %v1214_v63 }
 0xd86   : > { %v1671_v0 = vpop.eup %1670 }
 0xd87   : > { %v1216_v2 = vmul.f32 %v1671_v0, %v1208_v35 }
 0xd89   : > { %v1223_v5 = vmul.f32 %v1477_v1, %v1216_v2 }
 0xd8b   : > { %v1230_v21 = vadd.f32 %v1478_v4, %v1223_v5 }
 0xd8d   : > { %v1235_v6 = vpack.c.bf16 %v1230_v21, %v1230_v21 }
 0xd8f   : > { %1610 = vmatmul.mubr.msk.bf16.vlgmr.msra.gmra.mrb[32].mxu1 %vm494_vm1, %v1235_v6 }
 0xe62   : > { %v1282_v15 = vpop.f32.mrb[32].mxu1 }
 0xe63   : > { %v1283_v16 = vadd.f32 %v1479_v14, %v1282_v15  ;;  %v1611_v17 = vpop.f32.mrb[33].mxu1 }
 0xe64   : > { %v1285_v18 = vpop.f32.mrb[34].mxu1 }
 0xe65   : > { %v1288_v19 = vmax.f32 %v1283_v16, 0.0  ;;  %v1612_v3 = vpop.f32.mrb[35].mxu1 }
 0xe67   : > { %v1305_v20 = vpack.c.bf16 %v1288_v19, %v1288_v19 }
 0xe69   : > { %1630 = vmatmul.mubr.bf16.vlgmr.msra.gmra.mrb[20].mxu0 %v1305_v20 }
 0xf3c   : > { %v1355_v23 = vpop.f32.mrb[20].mxu0 }
 0xf3d   : > { %v1356_v24 = vadd.f32 %v1481_v22, %v1355_v23  ;;  %v1631_v25 = vpop.f32.mrb[21].mxu0 }
 0xf3e   : > { %v1358_v26 = vpop.f32.mrb[22].mxu0 }
 0xf3f   : > { %v1632_v27 = vpop.f32.mrb[23].mxu0  ;;  %v1361_v28 = vadd.f32 %v1356_v24, %v1230_v21 }
 0xf41   : > { %v1364_v29 = vsel %vm494_vm1, %v1361_v28, 0.0 }
 0xf42   : > { %1365 = vadd.xlane.f32.xlu1 %v1364_v29 }
 0xfcf   : > { %v1366_v30 = vpop.xlane.xlu1 %1365 }
 0xfd0   : > { %v1367_v31 = vmul.f32 0.03125, %v1366_v30 }
 0xfd2   : > { %v1368_v32 = vsub.f32 %v1361_v28, %v1367_v31 }
 0xfd4   : > { %v1369_v33 = vmul.f32 %v1368_v32, %v1368_v32 }
 0xfd6   : > { %v1370_v34 = vsel %vm494_vm1, %v1369_v33, 0.0 }
 0xfd7   : > { %1371 = vadd.xlane.f32.xlu1 %v1370_v34 }
0x1064   : > { %v1372_v35 = vpop.xlane.xlu1 %1371 }
0x1065   : > { %v1373_v36 = vmul.f32 0.03125, %v1372_v35 }
0x1067   : > { %v1374_v37 = vadd.f32 1e-05, %v1373_v36 }
0x1069   : > { %1672 = vrsqrt.f32 %v1374_v37 }
0x1073   : > { %v1673_v38 = vpop.eup %1672 }
0x1074   : > { %v1376_v40 = vmul.f32 %v1673_v38, %v1368_v32 }
0x1076   : > { %v1383_v41 = vmul.f32 %v1482_v39, %v1376_v40 }
0x1078   : > { %v1390_v42 = vadd.f32 %v1483_v7, %v1383_v41 }
0x107a   : > { %1391 = vst.msk [vmem:[%s476_s15] sm:$0xff] %vm494_vm1, %v1390_v42 }
0x107b PF: > { %s24_s29 = sadd.s32 1, %s1680_s29  }
0x107c   : > { %p21_p4 = scmp.ge.s32.totalorder %s24_s29, 4  }
0x107e   :  { %23 = sbr.rel (!%p21_p4) target bundleno = 1 (0x1), region = 109 }

</bundles_post_ra>
